<compile_context>
chip_gen: v5e
topology: v5e:2x2
jax: 0.10.0
libtpu: 0.0.40
codegen_flags: <defaults>
</compile_context>

<pallas_src>
import jax
import jax.numpy as jnp
from jax.experimental import pallas as pl
from jax.experimental.pallas import tpu as pltpu

BN_EPS = 1e-5
LRELU_SLOPE = 0.2
ROW_ALIGN = 16                      # sublane alignment for bf16 tiles
MAX_TM = 1024                       # rows per M tile (review: 1024-2048)
VMEM_LIMIT = 32 * 1024 * 1024       # explicit scoped-VMEM budget (v5e default: 16 MiB)


def _round_up(x, m):
    return (x + m - 1) // m * m


def _choose_tm(m):
    """Pick (tile_M, padded_M): largest tile <= MAX_TM, sublane aligned."""
    m_pad = _round_up(m, ROW_ALIGN)
    if m_pad <= MAX_TM:
        return m_pad, m_pad
    m_pad = _round_up(m, MAX_TM)
    return MAX_TM, m_pad


def _pad_rows(x, m_pad):
    if x.shape[0] == m_pad:
        return x
    return jnp.pad(x, ((0, m_pad - x.shape[0]), (0, 0)))


def _bytes(*arrs):
    return int(sum(a.size * a.dtype.itemsize for a in arrs))


def _compiler_params():
    return pltpu.CompilerParams(dimension_semantics=("parallel",),
                                vmem_limit_bytes=VMEM_LIMIT)


# ----------------------------- Pallas kernels ------------------------------

def _lrelu(x):
    return jnp.where(x > 0, x, LRELU_SLOPE * x)


def _conv_lrelu_kernel(x_ref, w_ref, b_ref, o_ref):
    # y = leaky_relu(X @ W + b); bf16 matmul operands, f32 accumulate/elementwise.
    acc = jnp.dot(x_ref[...], w_ref[...], preferred_element_type=jnp.float32)
    o_ref[...] = _lrelu(acc + b_ref[...]).astype(o_ref.dtype)


def _conv_stats_kernel(x_ref, w_ref, b_ref, y_ref, stats_ref):
    # Conv matmul tile + per-tile per-channel (sum, sumsq) partials.  Each tile
    # writes its own stats block, so the grid axis stays "parallel" (megacore).
    acc = jnp.dot(x_ref[...], w_ref[...], preferred_element_type=jnp.float32)
    acc = acc + b_ref[...]
    y_ref[...] = acc.astype(y_ref.dtype)
    stats_ref[0:1, :] = jnp.sum(acc, axis=0, keepdims=True)
    stats_ref[1:2, :] = jnp.sum(acc * acc, axis=0, keepdims=True)


def _bn_conv_stats_kernel(x_ref, s_ref, w_ref, b_ref, y_ref, stats_ref):
    # Previous layer's BN affine + LeakyReLU folded into the cols load
    # (cols were pre-centered by +shift/scale, so pads stay exactly zero).
    x = _lrelu(x_ref[...].astype(jnp.float32) * s_ref[...]).astype(jnp.bfloat16)
    acc = jnp.dot(x, w_ref[...], preferred_element_type=jnp.float32)
    acc = acc + b_ref[...]
    y_ref[...] = acc.astype(y_ref.dtype)
    stats_ref[0:1, :] = jnp.sum(acc, axis=0, keepdims=True)
    stats_ref[1:2, :] = jnp.sum(acc * acc, axis=0, keepdims=True)


def _bn_conv_sigmoid_kernel(x_ref, s_ref, w_ref, b_ref, o_ref):
    x = _lrelu(x_ref[...].astype(jnp.float32) * s_ref[...]).astype(jnp.bfloat16)
    acc = jnp.dot(x, w_ref[...], preferred_element_type=jnp.float32)
    acc = acc + b_ref[...]
    sig = pl.reciprocal(1.0 + jnp.exp(-acc), approx=True)   # EUP exp + rcp
    o_ref[...] = jnp.clip(sig, 0.0, 1.0).astype(o_ref.dtype)


# ----------------------------- kernel wrappers ------------------------------

def conv_lrelu(cols, w, b):
    """Fused (cols @ w + b) -> LeakyReLU, M-tiled, parallel over tiles."""
    m, k = cols.shape
    n = w.shape[1]
    tm, m_pad = _choose_tm(m)
    cols = _pad_rows(cols, m_pad)
    cost = pl.CostEstimate(flops=2 * m_pad * k * n, transcendentals=0,
                           bytes_accessed=_bytes(cols, w, b) + m_pad * n * 2)
    return pl.pallas_call(
        _conv_lrelu_kernel,
        out_shape=jax.ShapeDtypeStruct((m_pad, n), jnp.bfloat16),
        grid=(m_pad // tm,),
        in_specs=[pl.BlockSpec((tm, k), lambda i: (i, 0)),     # cols (streamed)
                  pl.BlockSpec((k, n), lambda i: (0, 0)),      # weights (resident)
                  pl.BlockSpec((1, n), lambda i: (0, 0))],     # bias (resident)
        out_specs=pl.BlockSpec((tm, n), lambda i: (i, 0)),
        compiler_params=_compiler_params(),
        cost_estimate=cost,
    )(cols, w, b)


def conv_stats(cols, w, b, scale_k=None):
    """Conv matmul phase of a conv+BN block.

    Computes y = [lrelu(cols * scale_k)] @ w + b tile-by-tile plus per-tile
    per-channel (sum, sumsq) partials.  When scale_k is given, the previous
    BN block's affine + LeakyReLU is applied to the (pre-centered) cols tile.
    Returns (y_padded, per_tile_stats, m_pad).
    """
    m, k = cols.shape
    n = w.shape[1]
    tm, m_pad = _choose_tm(m)
    cols = _pad_rows(cols, m_pad)
    num_tiles = m_pad // tm

    in_arrays = [cols]
    in_specs = [pl.BlockSpec((tm, k), lambda i: (i, 0))]
    if scale_k is not None:
        in_arrays.append(scale_k)
        in_specs.append(pl.BlockSpec((1, k), lambda i: (0, 0)))
        kernel = _bn_conv_stats_kernel
    else:
        kernel = _conv_stats_kernel
    in_arrays += [w, b]
    in_specs += [pl.BlockSpec((k, n), lambda i: (0, 0)),
                 pl.BlockSpec((1, n), lambda i: (0, 0))]

    cost = pl.CostEstimate(
        flops=2 * m_pad * k * n + 4 * m_pad * n,
        transcendentals=0,
        bytes_accessed=_bytes(*in_arrays) + m_pad * n * 2 + num_tiles * 2 * n * 4)

    y, stats = pl.pallas_call(
        kernel,
        out_shape=(jax.ShapeDtypeStruct((m_pad, n), jnp.bfloat16),
                   jax.ShapeDtypeStruct((num_tiles, 2, n), jnp.float32)),
        grid=(num_tiles,),
        in_specs=in_specs,
        out_specs=(pl.BlockSpec((tm, n), lambda i: (i, 0)),
                   # leading tile dim squeezed out -> kernel sees a (2, n) block
                   pl.BlockSpec((None, 2, n), lambda i: (i, 0, 0))),
        compiler_params=_compiler_params(),
        cost_estimate=cost,
    )(*in_arrays)
    return y, stats, m_pad


def bn_conv_sigmoid(cols, scale_k, w, b):
    """Previous BN affine + LReLU folded in, then conv matmul + bias + sigmoid."""
    m, k = cols.shape
    n = w.shape[1]
    tm, m_pad = _choose_tm(m)
    cols = _pad_rows(cols, m_pad)
    cost = pl.CostEstimate(flops=2 * m_pad * k * n + 3 * m_pad * k,
                           transcendentals=m_pad * n,
                           bytes_accessed=_bytes(cols, scale_k, w, b) + m_pad * n * 4)
    return pl.pallas_call(
        _bn_conv_sigmoid_kernel,
        out_shape=jax.ShapeDtypeStruct((m_pad, n), jnp.float32),
        grid=(m_pad // tm,),
        in_specs=[pl.BlockSpec((tm, k), lambda i: (i, 0)),
                  pl.BlockSpec((1, k), lambda i: (0, 0)),
                  pl.BlockSpec((k, n), lambda i: (0, 0)),
                  pl.BlockSpec((1, n), lambda i: (0, 0))],
        out_specs=pl.BlockSpec((tm, n), lambda i: (i, 0)),
        compiler_params=_compiler_params(),
        cost_estimate=cost,
    )(cols, scale_k, w, b)


def bn_affine(stats, bias, gamma, beta, m, m_pad):
    """Reduce per-tile stats and fold batch mean/var + (gamma, beta) into a
    per-channel (scale, shift).  Zero-padded cols rows pass exactly `bias`
    through the conv, so their contribution is removed analytically here."""
    tot = jnp.sum(stats, axis=0)                       # (2, n)
    pad_rows = float(m_pad - m)
    s = tot[0:1, :] - pad_rows * bias
    ss = tot[1:2, :] - pad_rows * bias * bias
    mean = s / m
    var = jnp.maximum(ss / m - mean * mean, 0.0)       # biased batch variance
    scale = gamma * jax.lax.rsqrt(var + BN_EPS)
    shift = beta - mean * scale
    return scale, shift


# ----------------------------- im2col glue ---------------------------------

def im2col(x_nhwc, k, stride, pad):
    """x: (B, H, W, C) -> (B*OH*OW, k*k*C) with K ordered (kh, kw, cin)."""
    if pad > 0:
        x_nhwc = jnp.pad(x_nhwc, ((0, 0), (pad, pad), (pad, pad), (0, 0)))
    B, H, W, C = x_nhwc.shape
    oh = (H - k) // stride + 1
    ow = (W - k) // stride + 1
    patches = []
    for i in range(k):
        for j in range(k):
            patches.append(
                x_nhwc[:, i:i + stride * oh:stride, j:j + stride * ow:stride, :])
    cols = jnp.stack(patches, axis=-2)                 # (B, oh, ow, k*k, C)
    return cols.reshape(B * oh * ow, k * k * C), oh, ow


def torch_weight_to_matmul(w_oihw, cin_pad=None):
    """(Cout, Cin, KH, KW) -> (KH*KW*Cin_pad, Cout), matching im2col K-order."""
    cout, cin, kh, kw = w_oihw.shape
    w = jnp.transpose(w_oihw, (2, 3, 1, 0))            # (kh, kw, cin, cout)
    if cin_pad is not None and cin_pad > cin:
        w = jnp.pad(w, ((0, 0), (0, 0), (0, cin_pad - cin), (0, 0)))
        cin = cin_pad
    return w.reshape(kh * kw * cin, cout)


# ----------------------------- parameters ----------------------------------

def init_params(key, input_channels=3):
    cin1_pad = _round_up(input_channels, 8)            # conv1 K -> 16*8 = 128
    #        name     cout cin            k  cin_pad   cout_pad
    specs = [("conv1", 32, input_channels, 4, cin1_pad, 32),
             ("conv2", 64, 32, 4, 32, 64),
             ("conv3", 128, 64, 4, 64, 128),
             ("conv4", 1, 128, 2, 128, 128)]           # conv4 kept lane-padded (M=B is tiny)
    params = {}
    for name, cout, cin, k, cin_pad, cout_pad in specs:
        key, kw_, kb_ = jax.random.split(key, 3)
        fan_in = cin * k * k
        bound = 1.0 / (fan_in ** 0.5)
        w = jax.random.uniform(kw_, (cout, cin, k, k), jnp.float32, -bound, bound)
        b = jax.random.uniform(kb_, (cout,), jnp.float32, -bound, bound)
        wm = torch_weight_to_matmul(w, cin_pad)        # (k*k*cin_pad, cout)
        if cout_pad > cout:
            wm = jnp.pad(wm, ((0, 0), (0, cout_pad - cout)))
            b = jnp.pad(b, (0, cout_pad - cout))
        params[name] = {
            "w": wm.astype(jnp.bfloat16),              # bf16 matmul operand
            "b": b.reshape(1, cout_pad).astype(jnp.float32),  # f32, post-accumulate
        }
    # BatchNorm affine params (PyTorch default init: weight=1, bias=0).
    for bn_name, c in (("bn2", 64), ("bn3", 128)):
        params[bn_name] = {"gamma": jnp.ones((1, c), jnp.float32),
                           "beta": jnp.zeros((1, c), jnp.float32)}
    return params


# ----------------------------- forward pass ---------------------------------

@jax.jit
def discriminator_forward(x_nchw, params):
    B = x_nchw.shape[0]
    x = jnp.transpose(x_nchw, (0, 2, 3, 1))            # NHWC
    c_in = x.shape[-1]
    c_pad = _round_up(c_in, 8)                         # align conv1's K (item: MXU/load align)
    if c_pad != c_in:
        x = jnp.pad(x, ((0, 0), (0, 0), (0, 0), (0, c_pad - c_in)))
    x = x.astype(jnp.bfloat16)

    # Block 1: Conv(3->32, k4 s2 p1) + LeakyReLU (one fused kernel, true Cout)
    cols, oh, ow = im2col(x, 4, 2, 1)
    m1 = B * oh * ow
    a1 = conv_lrelu(cols, params["conv1"]["w"], params["conv1"]["b"])
    x = a1[:m1].reshape(B, oh, ow, 32)

    # Block 2: Conv(32->64) + BatchNorm (training batch stats) + LeakyReLU.
    # Phase 1 computes the raw conv + per-tile stats; the affine + LReLU is
    # folded into the NEXT conv's kernel (removes one activation round trip).
    cols, oh, ow = im2col(x, 4, 2, 1)
    m2 = B * oh * ow
    y2, stats2, m2_pad = conv_stats(cols, params["conv2"]["w"], params["conv2"]["b"])
    scale2, shift2 = bn_affine(stats2, params["conv2"]["b"],
                               params["bn2"]["gamma"], params["bn2"]["beta"], m2, m2_pad)

    # Block 3: [BN2 + LReLU folded in] Conv(64->128) + BatchNorm + LeakyReLU.
    # Pre-center y2 by +shift/scale (fused by XLA into the im2col gather) so
    # the conv's zero padding maps to exactly 0 after lrelu(cols * scale).
    # NOTE: requires scale != 0 (true: gamma = 1, rsqrt(var+eps) > 0).
    x = (y2[:m2].astype(jnp.float32).reshape(B, oh, ow, 64)
         + (shift2 / scale2).reshape(1, 1, 1, 64)).astype(jnp.bfloat16)
    cols, oh, ow = im2col(x, 4, 2, 1)
    m3 = B * oh * ow
    scale2_k = jnp.tile(scale2, (1, 16))               # per-cin scale tiled over kh*kw
    y3, stats3, m3_pad = conv_stats(cols, params["conv3"]["w"], params["conv3"]["b"],
                                    scale_k=scale2_k)
    scale3, shift3 = bn_affine(stats3, params["conv3"]["b"],
                               params["bn3"]["gamma"], params["bn3"]["beta"], m3, m3_pad)

    # Block 4: [BN3 + LReLU folded in] Conv(128->1, k2 s1 p0) + Sigmoid.
    x = (y3[:m3].astype(jnp.float32).reshape(B, oh, ow, 128)
         + (shift3 / scale3).reshape(1, 1, 1, 128)).astype(jnp.bfloat16)
    cols, oh, ow = im2col(x, 2, 1, 0)
    m4 = B * oh * ow
    scale3_k = jnp.tile(scale3, (1, 4))
    out = bn_conv_sigmoid(cols, scale3_k, params["conv4"]["w"], params["conv4"]["b"])

    # (B*OH*OW, 128-padded) -> view(-1, 1).squeeze(1)  (1x1 spatial for 16x16
    # inputs, same caveat as the PyTorch reference for other input sizes).
    return out[:m4, :1].reshape(-1)


# ----------------------------- main -----------------------------------------

if __name__ == "__main__":
    key = jax.random.PRNGKey(0)
    k_params, k_x = jax.random.split(key)

    params = init_params(k_params, input_channels=3)
    # 16x16 input -> 8 -> 4 -> 2 -> 1x1, so output is one probability per image.
    x = jax.random.normal(k_x, (2, 3, 16, 16), jnp.float32)   # NCHW, like PyTorch

    out = discriminator_forward(x, params)
    out = jax.block_until_ready(out)

    assert out.shape == (2,), out.shape
    assert bool(jnp.all(jnp.isfinite(out)))
    assert bool(jnp.all((out >= 0.0) & (out <= 1.0)))
    print("KERNEL_OK")
</pallas_src>

<mosaic_0001>
module attributes {stable_mosaic.version = 11 : i64} {
  func.func @_conv_lrelu_kernel(%arg0: i32, %arg1: memref<128x128xbf16, #tpu.memory_space<vmem>>, %arg2: memref<128x32xbf16, #tpu.memory_space<vmem>>, %arg3: memref<1x32xf32, #tpu.memory_space<vmem>>, %arg4: memref<128x32xbf16, #tpu.memory_space<vmem>>) attributes {dimension_semantics = [#tpu.dimension_semantics<parallel>], iteration_bounds = array<i64: 1>, scalar_prefetch = 0 : i64, scratch_operands = 0 : i64, tpu.core_type = #tpu.core_type<tc>, window_params = [{transform_indices = @transform_0, window_bounds = array<i64: 128, 128>}, {pipeline_mode = #tpu.pipeline_mode<synchronous>, transform_indices = @transform_1, window_bounds = array<i64: 128, 32>}, {pipeline_mode = #tpu.pipeline_mode<synchronous>, transform_indices = @transform_2, window_bounds = array<i64: 1, 32>}, {transform_indices = @transform_3, window_bounds = array<i64: 128, 32>}]} {
    %c0 = arith.constant 0 : index
    %c0_0 = arith.constant 0 : index
    %0 = vector.load %arg1[%c0, %c0_0] : memref<128x128xbf16, #tpu.memory_space<vmem>>, vector<128x128xbf16>
    %c0_1 = arith.constant 0 : index
    %c0_2 = arith.constant 0 : index
    %1 = vector.load %arg2[%c0_1, %c0_2] : memref<128x32xbf16, #tpu.memory_space<vmem>>, vector<128x32xbf16>
    %cst = arith.constant dense<0.000000e+00> : vector<128x32xf32>
    %2 = tpu.matmul %0, %1, %cst {dimension_numbers = #tpu.dot_dimension_numbers<[1], [0], [0], [1], [0, 0, 1, 1], [], []>} : vector<128x128xbf16>, vector<128x32xbf16>, vector<128x32xf32> -> vector<128x32xf32>
    %c0_3 = arith.constant 0 : index
    %c0_4 = arith.constant 0 : index
    %3 = vector.load %arg3[%c0_3, %c0_4] : memref<1x32xf32, #tpu.memory_space<vmem>>, vector<1x32xf32>
    %4 = vector.broadcast %3 : vector<1x32xf32> to vector<128x32xf32>
    %5 = arith.addf %2, %4 : vector<128x32xf32>
    %cst_5 = arith.constant 0.000000e+00 : f32
    %6 = vector.broadcast %cst_5 : f32 to vector<128x32xf32>
    %7 = arith.cmpf ogt, %5, %6 : vector<128x32xf32>
    %cst_6 = arith.constant 2.000000e-01 : f32
    %8 = vector.broadcast %cst_6 : f32 to vector<128x32xf32>
    %9 = arith.mulf %8, %5 : vector<128x32xf32>
    %10 = arith.select %7, %5, %9 : vector<128x32xi1>, vector<128x32xf32>
    %11 = arith.truncf %10 : vector<128x32xf32> to vector<128x32xbf16>
    %c0_7 = arith.constant 0 : index
    %c0_8 = arith.constant 0 : index
    %12 = vector.load %arg4[%c0_7, %c0_8] : memref<128x32xbf16, #tpu.memory_space<vmem>>, vector<128x32xbf16>
    tpu.vector_store %arg4[%c0_7, %c0_8], %11 {strides = array<i32>} : memref<128x32xbf16, #tpu.memory_space<vmem>>, vector<128x32xbf16>,
    return
  }
  func.func @transform_0(%arg0: i32) -> (i32, i32) {
    %c0_i32 = arith.constant 0 : i32
    %c0_i32_0 = arith.constant 0 : i32
    return %arg0, %c0_i32 : i32, i32
  }
  func.func @transform_1(%arg0: i32) -> (i32, i32) {
    %c0_i32 = arith.constant 0 : i32
    %c0_i32_0 = arith.constant 0 : i32
    %c0_i32_1 = arith.constant 0 : i32
    return %c0_i32, %c0_i32_0 : i32, i32
  }
  func.func @transform_2(%arg0: i32) -> (i32, i32) {
    %c0_i32 = arith.constant 0 : i32
    %c0_i32_0 = arith.constant 0 : i32
    %c0_i32_1 = arith.constant 0 : i32
    return %c0_i32, %c0_i32_0 : i32, i32
  }
  func.func @transform_3(%arg0: i32) -> (i32, i32) {
    %c0_i32 = arith.constant 0 : i32
    %c0_i32_0 = arith.constant 0 : i32
    return %arg0, %c0_i32 : i32, i32
  }
}

module attributes {stable_mosaic.version = 11 : i64} {
  func.func @_conv_stats_kernel(%arg0: i32, %arg1: memref<32x512xbf16, #tpu.memory_space<vmem>>, %arg2: memref<512x64xbf16, #tpu.memory_space<vmem>>, %arg3: memref<1x64xf32, #tpu.memory_space<vmem>>, %arg4: memref<32x64xbf16, #tpu.memory_space<vmem>>, %arg5: memref<1x2x64xf32, #tpu.memory_space<vmem>>) attributes {dimension_semantics = [#tpu.dimension_semantics<parallel>], iteration_bounds = array<i64: 1>, scalar_prefetch = 0 : i64, scratch_operands = 0 : i64, tpu.core_type = #tpu.core_type<tc>, window_params = [{transform_indices = @transform_0, window_bounds = array<i64: 32, 512>}, {pipeline_mode = #tpu.pipeline_mode<synchronous>, transform_indices = @transform_1, window_bounds = array<i64: 512, 64>}, {pipeline_mode = #tpu.pipeline_mode<synchronous>, transform_indices = @transform_2, window_bounds = array<i64: 1, 64>}, {transform_indices = @transform_3, window_bounds = array<i64: 32, 64>}, {transform_indices = @transform_4, window_bounds = array<i64: 1, 2, 64>}]} {
    %c0 = arith.constant 0 : index
    %c0_0 = arith.constant 0 : index
    %0 = vector.load %arg1[%c0, %c0_0] : memref<32x512xbf16, #tpu.memory_space<vmem>>, vector<32x512xbf16>
    %c0_1 = arith.constant 0 : index
    %c0_2 = arith.constant 0 : index
    %1 = vector.load %arg2[%c0_1, %c0_2] : memref<512x64xbf16, #tpu.memory_space<vmem>>, vector<512x64xbf16>
    %cst = arith.constant dense<0.000000e+00> : vector<32x64xf32>
    %2 = tpu.matmul %0, %1, %cst {dimension_numbers = #tpu.dot_dimension_numbers<[1], [0], [0], [1], [0, 0, 1, 1], [], []>} : vector<32x512xbf16>, vector<512x64xbf16>, vector<32x64xf32> -> vector<32x64xf32>
    %c0_3 = arith.constant 0 : index
    %c0_4 = arith.constant 0 : index
    %3 = vector.load %arg3[%c0_3, %c0_4] : memref<1x64xf32, #tpu.memory_space<vmem>>, vector<1x64xf32>
    %4 = vector.broadcast %3 : vector<1x64xf32> to vector<32x64xf32>
    %5 = arith.addf %2, %4 : vector<32x64xf32>
    %6 = arith.truncf %5 : vector<32x64xf32> to vector<32x64xbf16>
    %c0_5 = arith.constant 0 : index
    %c0_6 = arith.constant 0 : index
    %7 = vector.load %arg4[%c0_5, %c0_6] : memref<32x64xbf16, #tpu.memory_space<vmem>>, vector<32x64xbf16>
    tpu.vector_store %arg4[%c0_5, %c0_6], %6 {strides = array<i32>} : memref<32x64xbf16, #tpu.memory_space<vmem>>, vector<32x64xbf16>,
    %cst_7 = arith.constant dense<0.000000e+00> : vector<64xf32>
    %8 = vector.multi_reduction <add>, %5, %cst_7 [0] : vector<32x64xf32> to vector<64xf32>
    %9 = vector.shape_cast %8 : vector<64xf32> to vector<1x64xf32>
    %c0_8 = arith.constant 0 : index
    %c0_9 = arith.constant 0 : index
    %c0_10 = arith.constant 0 : index
    %10 = vector.load %arg5[%c0_8, %c0_9, %c0_10] : memref<1x2x64xf32, #tpu.memory_space<vmem>>, vector<1x1x64xf32>
    %11 = vector.shape_cast %10 : vector<1x1x64xf32> to vector<1x64xf32>
    %12 = vector.shape_cast %9 : vector<1x64xf32> to vector<1x1x64xf32>
    tpu.vector_store %arg5[%c0_8, %c0_9, %c0_10], %12 {strides = array<i32>} : memref<1x2x64xf32, #tpu.memory_space<vmem>>, vector<1x1x64xf32>,
    %13 = arith.mulf %5, %5 : vector<32x64xf32>
    %cst_11 = arith.constant dense<0.000000e+00> : vector<64xf32>
    %14 = vector.multi_reduction <add>, %13, %cst_11 [0] : vector<32x64xf32> to vector<64xf32>
    %15 = vector.shape_cast %14 : vector<64xf32> to vector<1x64xf32>
    %c0_12 = arith.constant 0 : index
    %c1 = arith.constant 1 : index
    %c0_13 = arith.constant 0 : index
    %16 = vector.load %arg5[%c0_12, %c1, %c0_13] : memref<1x2x64xf32, #tpu.memory_space<vmem>>, vector<1x1x64xf32>
    %17 = vector.shape_cast %16 : vector<1x1x64xf32> to vector<1x64xf32>
    %18 = vector.shape_cast %15 : vector<1x64xf32> to vector<1x1x64xf32>
    tpu.vector_store %arg5[%c0_12, %c1, %c0_13], %18 {strides = array<i32>} : memref<1x2x64xf32, #tpu.memory_space<vmem>>, vector<1x1x64xf32>,
    return
  }
  func.func @transform_0(%arg0: i32) -> (i32, i32) {
    %c0_i32 = arith.constant 0 : i32
    %c0_i32_0 = arith.constant 0 : i32
    return %arg0, %c0_i32 : i32, i32
  }
  func.func @transform_1(%arg0: i32) -> (i32, i32) {
    %c0_i32 = arith.constant 0 : i32
    %c0_i32_0 = arith.constant 0 : i32
    %c0_i32_1 = arith.constant 0 : i32
    return %c0_i32, %c0_i32_0 : i32, i32
  }
  func.func @transform_2(%arg0: i32) -> (i32, i32) {
    %c0_i32 = arith.constant 0 : i32
    %c0_i32_0 = arith.constant 0 : i32
    %c0_i32_1 = arith.constant 0 : i32
    return %c0_i32, %c0_i32_0 : i32, i32
  }
  func.func @transform_3(%arg0: i32) -> (i32, i32) {
    %c0_i32 = arith.constant 0 : i32
    %c0_i32_0 = arith.constant 0 : i32
    return %arg0, %c0_i32 : i32, i32
  }
  func.func @transform_4(%arg0: i32) -> (i32, i32, i32) {
    %c0_i32 = arith.constant 0 : i32
    %c0_i32_0 = arith.constant 0 : i32
    %c0_i32_1 = arith.constant 0 : i32
    return %arg0, %c0_i32, %c0_i32_0 : i32, i32, i32
  }
}

module attributes {stable_mosaic.version = 11 : i64} {
  func.func @_bn_conv_stats_kernel(%arg0: i32, %arg1: memref<16x1024xbf16, #tpu.memory_space<vmem>>, %arg2: memref<1x1024xf32, #tpu.memory_space<vmem>>, %arg3: memref<1024x128xbf16, #tpu.memory_space<vmem>>, %arg4: memref<1x128xf32, #tpu.memory_space<vmem>>, %arg5: memref<16x128xbf16, #tpu.memory_space<vmem>>, %arg6: memref<1x2x128xf32, #tpu.memory_space<vmem>>) attributes {dimension_semantics = [#tpu.dimension_semantics<parallel>], iteration_bounds = array<i64: 1>, scalar_prefetch = 0 : i64, scratch_operands = 0 : i64, tpu.core_type = #tpu.core_type<tc>, window_params = [{transform_indices = @transform_0, window_bounds = array<i64: 16, 1024>}, {pipeline_mode = #tpu.pipeline_mode<synchronous>, transform_indices = @transform_1, window_bounds = array<i64: 1, 1024>}, {pipeline_mode = #tpu.pipeline_mode<synchronous>, transform_indices = @transform_2, window_bounds = array<i64: 1024, 128>}, {pipeline_mode = #tpu.pipeline_mode<synchronous>, transform_indices = @transform_3, window_bounds = array<i64: 1, 128>}, {transform_indices = @transform_4, window_bounds = array<i64: 16, 128>}, {transform_indices = @transform_5, window_bounds = array<i64: 1, 2, 128>}]} {
    %c0 = arith.constant 0 : index
    %c0_0 = arith.constant 0 : index
    %0 = vector.load %arg1[%c0, %c0_0] : memref<16x1024xbf16, #tpu.memory_space<vmem>>, vector<16x1024xbf16>
    %1 = arith.extf %0 : vector<16x1024xbf16> to vector<16x1024xf32>
    %c0_1 = arith.constant 0 : index
    %c0_2 = arith.constant 0 : index
    %2 = vector.load %arg2[%c0_1, %c0_2] : memref<1x1024xf32, #tpu.memory_space<vmem>>, vector<1x1024xf32>
    %3 = vector.broadcast %2 : vector<1x1024xf32> to vector<16x1024xf32>
    %4 = arith.mulf %1, %3 : vector<16x1024xf32>
    %cst = arith.constant 0.000000e+00 : f32
    %5 = vector.broadcast %cst : f32 to vector<16x1024xf32>
    %6 = arith.cmpf ogt, %4, %5 : vector<16x1024xf32>
    %cst_3 = arith.constant 2.000000e-01 : f32
    %7 = vector.broadcast %cst_3 : f32 to vector<16x1024xf32>
    %8 = arith.mulf %7, %4 : vector<16x1024xf32>
    %9 = arith.select %6, %4, %8 : vector<16x1024xi1>, vector<16x1024xf32>
    %10 = arith.truncf %9 : vector<16x1024xf32> to vector<16x1024xbf16>
    %c0_4 = arith.constant 0 : index
    %c0_5 = arith.constant 0 : index
    %11 = vector.load %arg3[%c0_4, %c0_5] : memref<1024x128xbf16, #tpu.memory_space<vmem>>, vector<1024x128xbf16>
    %cst_6 = arith.constant dense<0.000000e+00> : vector<16x128xf32>
    %12 = tpu.matmul %10, %11, %cst_6 {dimension_numbers = #tpu.dot_dimension_numbers<[1], [0], [0], [1], [0, 0, 1, 1], [], []>} : vector<16x1024xbf16>, vector<1024x128xbf16>, vector<16x128xf32> -> vector<16x128xf32>
    %c0_7 = arith.constant 0 : index
    %c0_8 = arith.constant 0 : index
    %13 = vector.load %arg4[%c0_7, %c0_8] : memref<1x128xf32, #tpu.memory_space<vmem>>, vector<1x128xf32>
    %14 = vector.broadcast %13 : vector<1x128xf32> to vector<16x128xf32>
    %15 = arith.addf %12, %14 : vector<16x128xf32>
    %16 = arith.truncf %15 : vector<16x128xf32> to vector<16x128xbf16>
    %c0_9 = arith.constant 0 : index
    %c0_10 = arith.constant 0 : index
    %17 = vector.load %arg5[%c0_9, %c0_10] : memref<16x128xbf16, #tpu.memory_space<vmem>>, vector<16x128xbf16>
    tpu.vector_store %arg5[%c0_9, %c0_10], %16 {strides = array<i32>} : memref<16x128xbf16, #tpu.memory_space<vmem>>, vector<16x128xbf16>,
    %cst_11 = arith.constant dense<0.000000e+00> : vector<128xf32>
    %18 = vector.multi_reduction <add>, %15, %cst_11 [0] : vector<16x128xf32> to vector<128xf32>
    %19 = vector.shape_cast %18 : vector<128xf32> to vector<1x128xf32>
    %c0_12 = arith.constant 0 : index
    %c0_13 = arith.constant 0 : index
    %c0_14 = arith.constant 0 : index
    %20 = vector.load %arg6[%c0_12, %c0_13, %c0_14] : memref<1x2x128xf32, #tpu.memory_space<vmem>>, vector<1x1x128xf32>
    %21 = vector.shape_cast %20 : vector<1x1x128xf32> to vector<1x128xf32>
    %22 = vector.shape_cast %19 : vector<1x128xf32> to vector<1x1x128xf32>
    tpu.vector_store %arg6[%c0_12, %c0_13, %c0_14], %22 {strides = array<i32>} : memref<1x2x128xf32, #tpu.memory_space<vmem>>, vector<1x1x128xf32>,
    %23 = arith.mulf %15, %15 : vector<16x128xf32>
    %cst_15 = arith.constant dense<0.000000e+00> : vector<128xf32>
    %24 = vector.multi_reduction <add>, %23, %cst_15 [0] : vector<16x128xf32> to vector<128xf32>
    %25 = vector.shape_cast %24 : vector<128xf32> to vector<1x128xf32>
    %c0_16 = arith.constant 0 : index
    %c1 = arith.constant 1 : index
    %c0_17 = arith.constant 0 : index
    %26 = vector.load %arg6[%c0_16, %c1, %c0_17] : memref<1x2x128xf32, #tpu.memory_space<vmem>>, vector<1x1x128xf32>
    %27 = vector.shape_cast %26 : vector<1x1x128xf32> to vector<1x128xf32>
    %28 = vector.shape_cast %25 : vector<1x128xf32> to vector<1x1x128xf32>
    tpu.vector_store %arg6[%c0_16, %c1, %c0_17], %28 {strides = array<i32>} : memref<1x2x128xf32, #tpu.memory_space<vmem>>, vector<1x1x128xf32>,
    return
  }
  func.func @transform_0(%arg0: i32) -> (i32, i32) {
    %c0_i32 = arith.constant 0 : i32
    %c0_i32_0 = arith.constant 0 : i32
    return %arg0, %c0_i32 : i32, i32
  }
  func.func @transform_1(%arg0: i32) -> (i32, i32) {
    %c0_i32 = arith.constant 0 : i32
    %c0_i32_0 = arith.constant 0 : i32
    %c0_i32_1 = arith.constant 0 : i32
    return %c0_i32, %c0_i32_0 : i32, i32
  }
  func.func @transform_2(%arg0: i32) -> (i32, i32) {
    %c0_i32 = arith.constant 0 : i32
    %c0_i32_0 = arith.constant 0 : i32
    %c0_i32_1 = arith.constant 0 : i32
    return %c0_i32, %c0_i32_0 : i32, i32
  }
  func.func @transform_3(%arg0: i32) -> (i32, i32) {
    %c0_i32 = arith.constant 0 : i32
    %c0_i32_0 = arith.constant 0 : i32
    %c0_i32_1 = arith.constant 0 : i32
    return %c0_i32, %c0_i32_0 : i32, i32
  }
  func.func @transform_4(%arg0: i32) -> (i32, i32) {
    %c0_i32 = arith.constant 0 : i32
    %c0_i32_0 = arith.constant 0 : i32
    return %arg0, %c0_i32 : i32, i32
  }
  func.func @transform_5(%arg0: i32) -> (i32, i32, i32) {
    %c0_i32 = arith.constant 0 : i32
    %c0_i32_0 = arith.constant 0 : i32
    %c0_i32_1 = arith.constant 0 : i32
    return %arg0, %c0_i32, %c0_i32_0 : i32, i32, i32
  }
}

module attributes {stable_mosaic.version = 11 : i64} {
  func.func @_bn_conv_sigmoid_kernel(%arg0: i32, %arg1: memref<16x512xbf16, #tpu.memory_space<vmem>>, %arg2: memref<1x512xf32, #tpu.memory_space<vmem>>, %arg3: memref<512x128xbf16, #tpu.memory_space<vmem>>, %arg4: memref<1x128xf32, #tpu.memory_space<vmem>>, %arg5: memref<16x128xf32, #tpu.memory_space<vmem>>) attributes {dimension_semantics = [#tpu.dimension_semantics<parallel>], iteration_bounds = array<i64: 1>, scalar_prefetch = 0 : i64, scratch_operands = 0 : i64, tpu.core_type = #tpu.core_type<tc>, window_params = [{transform_indices = @transform_0, window_bounds = array<i64: 16, 512>}, {pipeline_mode = #tpu.pipeline_mode<synchronous>, transform_indices = @transform_1, window_bounds = array<i64: 1, 512>}, {pipeline_mode = #tpu.pipeline_mode<synchronous>, transform_indices = @transform_2, window_bounds = array<i64: 512, 128>}, {pipeline_mode = #tpu.pipeline_mode<synchronous>, transform_indices = @transform_3, window_bounds = array<i64: 1, 128>}, {transform_indices = @transform_4, window_bounds = array<i64: 16, 128>}]} {
    %c0 = arith.constant 0 : index
    %c0_0 = arith.constant 0 : index
    %0 = vector.load %arg1[%c0, %c0_0] : memref<16x512xbf16, #tpu.memory_space<vmem>>, vector<16x512xbf16>
    %1 = arith.extf %0 : vector<16x512xbf16> to vector<16x512xf32>
    %c0_1 = arith.constant 0 : index
    %c0_2 = arith.constant 0 : index
    %2 = vector.load %arg2[%c0_1, %c0_2] : memref<1x512xf32, #tpu.memory_space<vmem>>, vector<1x512xf32>
    %3 = vector.broadcast %2 : vector<1x512xf32> to vector<16x512xf32>
    %4 = arith.mulf %1, %3 : vector<16x512xf32>
    %cst = arith.constant 0.000000e+00 : f32
    %5 = vector.broadcast %cst : f32 to vector<16x512xf32>
    %6 = arith.cmpf ogt, %4, %5 : vector<16x512xf32>
    %cst_3 = arith.constant 2.000000e-01 : f32
    %7 = vector.broadcast %cst_3 : f32 to vector<16x512xf32>
    %8 = arith.mulf %7, %4 : vector<16x512xf32>
    %9 = arith.select %6, %4, %8 : vector<16x512xi1>, vector<16x512xf32>
    %10 = arith.truncf %9 : vector<16x512xf32> to vector<16x512xbf16>
    %c0_4 = arith.constant 0 : index
    %c0_5 = arith.constant 0 : index
    %11 = vector.load %arg3[%c0_4, %c0_5] : memref<512x128xbf16, #tpu.memory_space<vmem>>, vector<512x128xbf16>
    %cst_6 = arith.constant dense<0.000000e+00> : vector<16x128xf32>
    %12 = tpu.matmul %10, %11, %cst_6 {dimension_numbers = #tpu.dot_dimension_numbers<[1], [0], [0], [1], [0, 0, 1, 1], [], []>} : vector<16x512xbf16>, vector<512x128xbf16>, vector<16x128xf32> -> vector<16x128xf32>
    %c0_7 = arith.constant 0 : index
    %c0_8 = arith.constant 0 : index
    %13 = vector.load %arg4[%c0_7, %c0_8] : memref<1x128xf32, #tpu.memory_space<vmem>>, vector<1x128xf32>
    %14 = vector.broadcast %13 : vector<1x128xf32> to vector<16x128xf32>
    %15 = arith.addf %12, %14 : vector<16x128xf32>
    %cst_9 = arith.constant 0.000000e+00 : f32
    %16 = vector.broadcast %cst_9 : f32 to vector<16x128xf32>
    %17 = arith.subf %16, %15 : vector<16x128xf32>
    %18 = math.exp %17 : vector<16x128xf32>
    %cst_10 = arith.constant 1.000000e+00 : f32
    %19 = vector.broadcast %cst_10 : f32 to vector<16x128xf32>
    %20 = arith.addf %19, %18 : vector<16x128xf32>
    %21 = tpu.reciprocal %20 {approx = true} : vector<16x128xf32> -> vector<16x128xf32>
    %cst_11 = arith.constant 0.000000e+00 : f32
    %cst_12 = arith.constant 1.000000e+00 : f32
    %22 = vector.broadcast %cst_11 : f32 to vector<16x128xf32>
    %23 = arith.maximumf %22, %21 : vector<16x128xf32>
    %24 = vector.broadcast %cst_12 : f32 to vector<16x128xf32>
    %25 = arith.minimumf %24, %23 : vector<16x128xf32>
    %c0_13 = arith.constant 0 : index
    %c0_14 = arith.constant 0 : index
    %26 = vector.load %arg5[%c0_13, %c0_14] : memref<16x128xf32, #tpu.memory_space<vmem>>, vector<16x128xf32>
    tpu.vector_store %arg5[%c0_13, %c0_14], %25 {strides = array<i32>} : memref<16x128xf32, #tpu.memory_space<vmem>>, vector<16x128xf32>,
    return
  }
  func.func @transform_0(%arg0: i32) -> (i32, i32) {
    %c0_i32 = arith.constant 0 : i32
    %c0_i32_0 = arith.constant 0 : i32
    return %arg0, %c0_i32 : i32, i32
  }
  func.func @transform_1(%arg0: i32) -> (i32, i32) {
    %c0_i32 = arith.constant 0 : i32
    %c0_i32_0 = arith.constant 0 : i32
    %c0_i32_1 = arith.constant 0 : i32
    return %c0_i32, %c0_i32_0 : i32, i32
  }
  func.func @transform_2(%arg0: i32) -> (i32, i32) {
    %c0_i32 = arith.constant 0 : i32
    %c0_i32_0 = arith.constant 0 : i32
    %c0_i32_1 = arith.constant 0 : i32
    return %c0_i32, %c0_i32_0 : i32, i32
  }
  func.func @transform_3(%arg0: i32) -> (i32, i32) {
    %c0_i32 = arith.constant 0 : i32
    %c0_i32_0 = arith.constant 0 : i32
    %c0_i32_1 = arith.constant 0 : i32
    return %c0_i32, %c0_i32_0 : i32, i32
  }
  func.func @transform_4(%arg0: i32) -> (i32, i32) {
    %c0_i32 = arith.constant 0 : i32
    %c0_i32_0 = arith.constant 0 : i32
    return %arg0, %c0_i32 : i32, i32
  }
}

</mosaic_0001>

<bundles_post_ra>
// kernel: discriminator_forward.4
= control target key start
LH: loop header
LB: loop body
LE: loop exit
PB: predicated region body
PF: predicated region fallthrough
CT: control target
= control target key end

     0   :  { %vm259_vm2 = vcmask 257024   ;;  %s538_s1 = inlined_call_operand.vmem [shape: bf16[128,32], index: 1, kind: input, shape index: {}]   ;;  %s539_s2 = inlined_call_operand.vmem [shape: f32[1,32], index: 2, kind: input, shape index: {}]   ;;  %s540_s0 = inlined_call_operand.vmem [shape: bf16[128,128], index: 0, kind: input, shape index: {}]   ;;  %s541_s3 = inlined_call_operand.vmem [shape: bf16[128,32], index: 3, kind: output, shape index: {}]  }
   0x1   :  { %v359_v0 = vld [vmem:[%s538_s1 + $0x38] sm:$0xff]  ;;  %v358_v1 = vld [vmem:[%s538_s1 + $0x30] sm:$0xff]  ;;  %v357_v2 = vld [vmem:[%s538_s1 + $0x28] sm:$0xff] }
   0x2   :  { %146 = vmatpush.bf16.msra.mxu0 %v359_v0  ;;  %360 = vmatpush.bf16.msra.mxu1 %v359_v0  ;;  %v356_v3 = vld [vmem:[%s538_s1 + $0x20] sm:$0xff]  ;;  %v355_v4 = vld [vmem:[%s538_s1 + $0x18] sm:$0xff]  ;;  %v354_v5 = vld [vmem:[%s538_s1 + $0x10] sm:$0xff] }
   0x3   :  { %361 = vmatpush.bf16.msra.mxu2 %v359_v0  ;;  %362 = vmatpush.bf16.msra.mxu3 %v359_v0  ;;  %v353_v6 = vld [vmem:[%s538_s1 + $0x8] sm:$0xff]  ;;  %v352_v7 = vld [vmem:[%s538_s1] sm:$0xff]  ;;  %v346_v9 = vld [vmem:[%s540_s0 + $0x10] sm:$0xff] }
   0x4   :  { %v344_v8 = vld [vmem:[%s540_s0] sm:$0xff]  ;;  %v350_v11 = vld [vmem:[%s540_s0 + $0x30] sm:$0xff]  ;;  %v345_v12 = vld [vmem:[%s540_s0 + $0x8] sm:$0xff] }
   0x5   :  { %v348_v10 = vld [vmem:[%s540_s0 + $0x20] sm:$0xff]  ;;  %v347_v13 = vld [vmem:[%s540_s0 + $0x18] sm:$0xff]  ;;  %v349_v14 = vld [vmem:[%s540_s0 + $0x28] sm:$0xff] }
   0x6   :  { %147 = vmatpush.bf16.msra.mxu0 %v358_v1  ;;  %363 = vmatpush.bf16.msra.mxu1 %v358_v1  ;;  %v351_v15 = vld [vmem:[%s540_s0 + $0x38] sm:$0xff]  ;;  %v456_v16 = vld [vmem:[%s539_s2] ss:$0 sm:$0xff] }
   0x7   :  { %364 = vmatpush.bf16.msra.mxu2 %v358_v1  ;;  %365 = vmatpush.bf16.msra.mxu3 %v358_v1 }
   0xa   :  { %148 = vmatpush.bf16.msra.mxu0 %v357_v2  ;;  %366 = vmatpush.bf16.msra.mxu1 %v357_v2 }
   0xb   :  { %367 = vmatpush.bf16.msra.mxu2 %v357_v2  ;;  %368 = vmatpush.bf16.msra.mxu3 %v357_v2 }
   0xe   :  { %149 = vmatpush.bf16.msra.mxu0 %v356_v3  ;;  %369 = vmatpush.bf16.msra.mxu1 %v356_v3 }
   0xf   :  { %370 = vmatpush.bf16.msra.mxu2 %v356_v3  ;;  %371 = vmatpush.bf16.msra.mxu3 %v356_v3 }
  0x12   :  { %150 = vmatpush.bf16.msra.mxu0 %v355_v4  ;;  %372 = vmatpush.bf16.msra.mxu1 %v355_v4 }
  0x13   :  { %373 = vmatpush.bf16.msra.mxu2 %v355_v4  ;;  %374 = vmatpush.bf16.msra.mxu3 %v355_v4 }
  0x16   :  { %151 = vmatpush.bf16.msra.mxu0 %v354_v5  ;;  %375 = vmatpush.bf16.msra.mxu1 %v354_v5 }
  0x17   :  { %376 = vmatpush.bf16.msra.mxu2 %v354_v5  ;;  %377 = vmatpush.bf16.msra.mxu3 %v354_v5 }
  0x1a   :  { %152 = vmatpush.bf16.msra.mxu0 %v353_v6  ;;  %378 = vmatpush.bf16.msra.mxu1 %v353_v6 }
  0x1b   :  { %379 = vmatpush.bf16.msra.mxu2 %v353_v6  ;;  %380 = vmatpush.bf16.msra.mxu3 %v353_v6 }
  0x1e   :  { %153 = vmatpush.bf16.msra.mxu0 %v352_v7  ;;  %381 = vmatpush.bf16.msra.mxu1 %v352_v7 }
  0x1f   :  { %382 = vmatpush.bf16.msra.mxu2 %v352_v7  ;;  %383 = vmatpush.bf16.msra.mxu3 %v352_v7 }
  0x21   :  { %154 = vmatmul.bf16.vlgmr.msra.gmra.mxu0 %v344_v8  ;;  %164 = vmatmul.bf16.vlgmr.msra.gmra.mxu1 %v346_v9 }
  0x22   :  { %174 = vmatmul.bf16.vlgmr.msra.gmra.mxu2 %v348_v10  ;;  %184 = vmatmul.bf16.vlgmr.msra.gmra.mxu3 %v350_v11 }
  0x31   :  { %159 = vmatmul.bf16.gmra.mxu0 %v345_v12  ;;  %169 = vmatmul.bf16.gmra.mxu1 %v347_v13 }
  0x32   :  { %179 = vmatmul.bf16.gmra.mxu2 %v349_v14  ;;  %189 = vmatmul.bf16.gmra.mxu3 %v351_v15 }
  0x9e   :  { %v155_v17 = vpop.f32.mrf.mxu0  ;;  %v165_v18 = vpop.f32.mrf.mxu1 }
  0x9f   :  { %v156_v19 = vadd.f32 %v456_v16, %v155_v17  ;;  %v166_v20 = vadd.f32 %v456_v16, %v165_v18 }
  0xa1   :  { %vm195_vm0 = vcmp.gt.f32.partialorder %v156_v19, 0.0  ;;  %v211_v21 = vmul.f32 0.2, %v156_v19  ;;  %vm199_vm1 = vcmp.gt.f32.partialorder %v166_v20, 0.0  ;;  %v215_v22 = vmul.f32 0.2, %v166_v20 }
  0xa3   :  { %v227_v23 = vsel %vm195_vm0, %v156_v19, %v211_v21  ;;  %v231_v24 = vsel %vm199_vm1, %v166_v20, %v215_v22 }
  0xa4   :  { %v243_v25 = vpack.c.bf16 %v227_v23, %v227_v23  ;;  %v247_v26 = vpack.c.bf16 %v231_v24, %v231_v24 }
  0xa5   :  { %v175_v27 = vpop.f32.mrf.mxu2  ;;  %v185_v28 = vpop.f32.mrf.mxu3 }
  0xa6   :  { %260 = vst.msk [vmem:[%s541_s3] sm:$0xf] %vm259_vm2, %v243_v25  ;;  %v176_v29 = vadd.f32 %v456_v16, %v175_v27  ;;  %v186_v30 = vadd.f32 %v456_v16, %v185_v28  ;;  %v157_v31 = vpop.f32.mrf.mxu0  ;;  %v167_v32 = vpop.f32.mrf.mxu1 }
  0xa7   :  { %264 = vst.msk [vmem:[%s541_s3 + $0x10] sm:$0xf] %vm259_vm2, %v247_v26  ;;  %v158_v33 = vadd.f32 %v456_v16, %v157_v31  ;;  %v168_v34 = vadd.f32 %v456_v16, %v167_v32 }
  0xa8   :  { %vm203_vm3 = vcmp.gt.f32.partialorder %v176_v29, 0.0  ;;  %v219_v35 = vmul.f32 0.2, %v176_v29  ;;  %vm207_vm4 = vcmp.gt.f32.partialorder %v186_v30, 0.0  ;;  %v223_v36 = vmul.f32 0.2, %v186_v30 }
  0xa9   :  { %vm196_vm5 = vcmp.gt.f32.partialorder %v158_v33, 0.0  ;;  %v212_v37 = vmul.f32 0.2, %v158_v33  ;;  %vm200_vm6 = vcmp.gt.f32.partialorder %v168_v34, 0.0  ;;  %v216_v38 = vmul.f32 0.2, %v168_v34 }
  0xaa   :  { %v235_v39 = vsel %vm203_vm3, %v176_v29, %v219_v35  ;;  %v239_v40 = vsel %vm207_vm4, %v186_v30, %v223_v36 }
  0xab   :  { %v251_v41 = vpack.c.bf16 %v235_v39, %v235_v39  ;;  %v255_v42 = vpack.c.bf16 %v239_v40, %v239_v40  ;;  %v228_v43 = vsel %vm196_vm5, %v158_v33, %v212_v37  ;;  %v232_v44 = vsel %vm200_vm6, %v168_v34, %v216_v38 }
  0xac   :  { %v244_v45 = vpack.c.bf16 %v228_v43, %v228_v43  ;;  %v248_v46 = vpack.c.bf16 %v232_v44, %v232_v44 }
  0xad   :  { %268 = vst.msk [vmem:[%s541_s3 + $0x20] sm:$0xf] %vm259_vm2, %v251_v41  ;;  %v177_v47 = vpop.f32.mrf.mxu2  ;;  %v187_v48 = vpop.f32.mrf.mxu3 }
  0xae   :  { %272 = vst.msk [vmem:[%s541_s3 + $0x30] sm:$0xf] %vm259_vm2, %v255_v42  ;;  %v178_v49 = vadd.f32 %v456_v16, %v177_v47  ;;  %v188_v50 = vadd.f32 %v456_v16, %v187_v48  ;;  %v160_v51 = vpop.f32.mrf.mxu0  ;;  %v170_v52 = vpop.f32.mrf.mxu1 }
  0xaf   :  { %261 = vst.msk [vmem:[%s541_s3 + $0x4] sm:$0xf] %vm259_vm2, %v244_v45  ;;  %v161_v53 = vadd.f32 %v456_v16, %v160_v51  ;;  %v171_v54 = vadd.f32 %v456_v16, %v170_v52 }
  0xb0   :  { %265 = vst.msk [vmem:[%s541_s3 + $0x14] sm:$0xf] %vm259_vm2, %v248_v46  ;;  %vm204_vm7 = vcmp.gt.f32.partialorder %v178_v49, 0.0  ;;  %v220_v55 = vmul.f32 0.2, %v178_v49  ;;  %vm208_vm8 = vcmp.gt.f32.partialorder %v188_v50, 0.0 }
  0xb1   :  { %v224_v56 = vmul.f32 0.2, %v188_v50  ;;  %vm197_vm9 = vcmp.gt.f32.partialorder %v161_v53, 0.0  ;;  %v213_v57 = vmul.f32 0.2, %v161_v53  ;;  %vm201_vm10 = vcmp.gt.f32.partialorder %v171_v54, 0.0 }
  0xb2   :  { %v236_v58 = vsel %vm204_vm7, %v178_v49, %v220_v55  ;;  %v217_v59 = vmul.f32 0.2, %v171_v54 }
  0xb3   :  { %v252_v60 = vpack.c.bf16 %v236_v58, %v236_v58  ;;  %v240_v61 = vsel %vm208_vm8, %v188_v50, %v224_v56  ;;  %v229_v62 = vsel %vm197_vm9, %v161_v53, %v213_v57 }
  0xb4   :  { %v256_v63 = vpack.c.bf16 %v240_v61, %v240_v61  ;;  %v245_v0 = vpack.c.bf16 %v229_v62, %v229_v62  ;;  %v233_v1 = vsel %vm201_vm10, %v171_v54, %v217_v59 }
  0xb5   :  { %269 = vst.msk [vmem:[%s541_s3 + $0x24] sm:$0xf] %vm259_vm2, %v252_v60  ;;  %v249_v2 = vpack.c.bf16 %v233_v1, %v233_v1  ;;  %v180_v3 = vpop.f32.mrf.mxu2  ;;  %v190_v4 = vpop.f32.mrf.mxu3 }
  0xb6   :  { %273 = vst.msk [vmem:[%s541_s3 + $0x34] sm:$0xf] %vm259_vm2, %v256_v63  ;;  %v181_v5 = vadd.f32 %v456_v16, %v180_v3  ;;  %v191_v6 = vadd.f32 %v456_v16, %v190_v4  ;;  %v162_v7 = vpop.f32.mrf.mxu0  ;;  %v172_v8 = vpop.f32.mrf.mxu1 }
  0xb7   :  { %262 = vst.msk [vmem:[%s541_s3 + $0x8] sm:$0xf] %vm259_vm2, %v245_v0  ;;  %v163_v9 = vadd.f32 %v456_v16, %v162_v7  ;;  %v173_v10 = vadd.f32 %v456_v16, %v172_v8 }
  0xb8   :  { %266 = vst.msk [vmem:[%s541_s3 + $0x18] sm:$0xf] %vm259_vm2, %v249_v2  ;;  %vm205_vm11 = vcmp.gt.f32.partialorder %v181_v5, 0.0  ;;  %v221_v11 = vmul.f32 0.2, %v181_v5  ;;  %vm209_vm12 = vcmp.gt.f32.partialorder %v191_v6, 0.0 }
  0xb9   :  { %v225_v12 = vmul.f32 0.2, %v191_v6  ;;  %vm198_vm13 = vcmp.gt.f32.partialorder %v163_v9, 0.0  ;;  %v214_v13 = vmul.f32 0.2, %v163_v9  ;;  %vm202_vm14 = vcmp.gt.f32.partialorder %v173_v10, 0.0 }
  0xba   :  { %v237_v14 = vsel %vm205_vm11, %v181_v5, %v221_v11  ;;  %v218_v15 = vmul.f32 0.2, %v173_v10 }
  0xbb   :  { %v253_v17 = vpack.c.bf16 %v237_v14, %v237_v14  ;;  %v241_v18 = vsel %vm209_vm12, %v191_v6, %v225_v12  ;;  %v230_v19 = vsel %vm198_vm13, %v163_v9, %v214_v13 }
  0xbc   :  { %v257_v20 = vpack.c.bf16 %v241_v18, %v241_v18  ;;  %v246_v21 = vpack.c.bf16 %v230_v19, %v230_v19  ;;  %v234_v22 = vsel %vm202_vm14, %v173_v10, %v218_v15 }
  0xbd   :  { %270 = vst.msk [vmem:[%s541_s3 + $0x28] sm:$0xf] %vm259_vm2, %v253_v17  ;;  %v250_v23 = vpack.c.bf16 %v234_v22, %v234_v22  ;;  %v182_v24 = vpop.f32.mrf.mxu2  ;;  %v192_v25 = vpop.f32.mrf.mxu3 }
  0xbe   :  { %274 = vst.msk [vmem:[%s541_s3 + $0x38] sm:$0xf] %vm259_vm2, %v257_v20  ;;  %v183_v26 = vadd.f32 %v456_v16, %v182_v24  ;;  %v193_v27 = vadd.f32 %v456_v16, %v192_v25 }
  0xbf   :  { %263 = vst.msk [vmem:[%s541_s3 + $0xc] sm:$0xf] %vm259_vm2, %v246_v21 }
  0xc0   :  { %267 = vst.msk [vmem:[%s541_s3 + $0x1c] sm:$0xf] %vm259_vm2, %v250_v23  ;;  %vm206_vm15 = vcmp.gt.f32.partialorder %v183_v26, 0.0  ;;  %v222_v28 = vmul.f32 0.2, %v183_v26  ;;  %vm210_vm0 = vcmp.gt.f32.partialorder %v193_v27, 0.0 }
  0xc1   :  { %v226_v29 = vmul.f32 0.2, %v193_v27 }
  0xc2   :  { %v238_v30 = vsel %vm206_vm15, %v183_v26, %v222_v28 }
  0xc3   :  { %v254_v31 = vpack.c.bf16 %v238_v30, %v238_v30  ;;  %v242_v32 = vsel %vm210_vm0, %v193_v27, %v226_v29 }
  0xc4   :  { %v258_v33 = vpack.c.bf16 %v242_v32, %v242_v32 }
  0xc5   :  { %271 = vst.msk [vmem:[%s541_s3 + $0x2c] sm:$0xf] %vm259_vm2, %v254_v31 }
  0xc6   :  { %275 = vst.msk [vmem:[%s541_s3 + $0x3c] sm:$0xf] %vm259_vm2, %v258_v33 }

// kernel: discriminator_forward.5
= control target key start
LH: loop header
LB: loop body
LE: loop exit
PB: predicated region body
PF: predicated region fallthrough
CT: control target
= control target key end

     0   :  { %vm404_vm0 = vcmask 519168   ;;  %vm409_vm1 = vcmask 523264   ;;  %vm423_vm2 = vcmask 516096   ;;  %s854_s1 = inlined_call_operand.vmem [shape: bf16[512,64], index: 1, kind: input, shape index: {}]   ;;  %s855_s2 = inlined_call_operand.vmem [shape: f32[1,64], index: 2, kind: input, shape index: {}]   ;;  %s856_s0 = inlined_call_operand.vmem [shape: bf16[32,512], index: 0, kind: input, shape index: {}]   ;;  %s857_s3 = inlined_call_operand.vmem [shape: bf16[32,64], index: 3, kind: output, shape index: {0}]   ;;  %s858_s4 = inlined_call_operand.vmem [shape: f32[1,2,64], index: 4, kind: output, shape index: {1}]  }
   0x1   :  { %v626_v0 = vld [vmem:[%s854_s1 + $0x38] sm:$0xff]  ;;  %v625_v4 = vld [vmem:[%s854_s1 + $0x30] sm:$0xff]  ;;  %v624_v8 = vld [vmem:[%s854_s1 + $0x28] sm:$0xff] }
   0x2   :  { %v634_v1 = vld [vmem:[%s854_s1 + $0x78] sm:$0xff]  ;;  %324 = vmatpush.bf16.msra.mxu0 %v626_v0  ;;  %v633_v5 = vld [vmem:[%s854_s1 + $0x70] sm:$0xff]  ;;  %v632_v9 = vld [vmem:[%s854_s1 + $0x68] sm:$0xff] }
   0x3   :  { %v642_v2 = vld [vmem:[%s854_s1 + $0xb8] sm:$0xff]  ;;  %343 = vmatpush.bf16.msra.mxu1 %v634_v1  ;;  %v641_v6 = vld [vmem:[%s854_s1 + $0xb0] sm:$0xff]  ;;  %v640_v10 = vld [vmem:[%s854_s1 + $0xa8] sm:$0xff] }
   0x4   :  { %v650_v3 = vld [vmem:[%s854_s1 + $0xf8] sm:$0xff]  ;;  %362 = vmatpush.bf16.msra.mxu2 %v642_v2  ;;  %v649_v7 = vld [vmem:[%s854_s1 + $0xf0] sm:$0xff]  ;;  %v648_v11 = vld [vmem:[%s854_s1 + $0xe8] sm:$0xff] }
   0x5   :  { %381 = vmatpush.bf16.msra.mxu3 %v650_v3  ;;  %v623_v12 = vld [vmem:[%s854_s1 + $0x20] sm:$0xff]  ;;  %v622_v16 = vld [vmem:[%s854_s1 + $0x18] sm:$0xff]  ;;  %v621_v20 = vld [vmem:[%s854_s1 + $0x10] sm:$0xff] }
   0x6   :  { %325 = vmatpush.bf16.msra.mxu0 %v625_v4  ;;  %v631_v13 = vld [vmem:[%s854_s1 + $0x60] sm:$0xff]  ;;  %v630_v17 = vld [vmem:[%s854_s1 + $0x58] sm:$0xff]  ;;  %v629_v21 = vld [vmem:[%s854_s1 + $0x50] sm:$0xff] }
   0x7   :  { %344 = vmatpush.bf16.msra.mxu1 %v633_v5  ;;  %v639_v14 = vld [vmem:[%s854_s1 + $0xa0] sm:$0xff]  ;;  %v638_v18 = vld [vmem:[%s854_s1 + $0x98] sm:$0xff]  ;;  %v637_v22 = vld [vmem:[%s854_s1 + $0x90] sm:$0xff] }
   0x8   :  { %363 = vmatpush.bf16.msra.mxu2 %v641_v6  ;;  %v647_v15 = vld [vmem:[%s854_s1 + $0xe0] sm:$0xff]  ;;  %v646_v19 = vld [vmem:[%s854_s1 + $0xd8] sm:$0xff]  ;;  %v645_v23 = vld [vmem:[%s854_s1 + $0xd0] sm:$0xff] }
   0x9   :  { %382 = vmatpush.bf16.msra.mxu3 %v649_v7  ;;  %v620_v24 = vld [vmem:[%s854_s1 + $0x8] sm:$0xff]  ;;  %v619_v28 = vld [vmem:[%s854_s1] sm:$0xff]  ;;  %v613_v33 = vld [vmem:[%s856_s0 + $0xc] sm:$0xf0] }
   0xa   :  { %326 = vmatpush.bf16.msra.mxu0 %v624_v8  ;;  %v628_v25 = vld [vmem:[%s854_s1 + $0x48] sm:$0xff]  ;;  %v627_v29 = vld [vmem:[%s854_s1 + $0x40] sm:$0xff]  ;;  %v455_v35 = vld [vmem:[%s856_s0 + $0x10] sm:$0xf0] }
   0xb   :  { %345 = vmatpush.bf16.msra.mxu1 %v632_v9  ;;  %v636_v26 = vld [vmem:[%s854_s1 + $0x88] sm:$0xff]  ;;  %v635_v30 = vld [vmem:[%s854_s1 + $0x80] sm:$0xff]  ;;  %v614_v37 = vld [vmem:[%s856_s0 + $0x14] sm:$0xf0] }
   0xc   :  { %364 = vmatpush.bf16.msra.mxu2 %v640_v10  ;;  %v644_v27 = vld [vmem:[%s854_s1 + $0xc8] sm:$0xff]  ;;  %v643_v31 = vld [vmem:[%s854_s1 + $0xc0] sm:$0xff]  ;;  %v463_v39 = vld [vmem:[%s856_s0 + $0x18] sm:$0xf0] }
   0xd   :  { %383 = vmatpush.bf16.msra.mxu3 %v648_v11  ;;  %v453_v32 = vld [vmem:[%s856_s0] sm:$0xf]  ;;  %v611_v34 = vld [vmem:[%s856_s0 + $0x4] sm:$0xf]  ;;  %v461_v36 = vld [vmem:[%s856_s0 + $0x8] sm:$0xf] }
   0xe   :  { %327 = vmatpush.bf16.msra.mxu0 %v623_v12  ;;  %v612_v38 = vld [vmem:[%s856_s0 + $0xc] sm:$0xf]  ;;  %v454_v40 = vor.u32 %v613_v33, %v453_v32  ;;  %v458_v41 = vor.u32 %v611_v34, %v455_v35  ;;  %v462_v42 = vor.u32 %v614_v37, %v461_v36  ;;  %v469_v44 = vld [vmem:[%s856_s0 + $0x20] sm:$0xf]  ;;  %v617_v45 = vld [vmem:[%s856_s0 + $0x2c] sm:$0xf0] }
   0xf   :  { %346 = vmatpush.bf16.msra.mxu1 %v631_v13  ;;  %v466_v43 = vor.u32 %v612_v38, %v463_v39  ;;  %v615_v46 = vld [vmem:[%s856_s0 + $0x24] sm:$0xf]  ;;  %v471_v47 = vld [vmem:[%s856_s0 + $0x30] sm:$0xf0]  ;;  %v477_v48 = vld [vmem:[%s856_s0 + $0x28] sm:$0xf]  ;;  %v470_v52 = vor.u32 %v617_v45, %v469_v44 }
  0x10   :  { %365 = vmatpush.bf16.msra.mxu2 %v639_v14  ;;  %v618_v49 = vld [vmem:[%s856_s0 + $0x34] sm:$0xf0]  ;;  %v616_v50 = vld [vmem:[%s856_s0 + $0x2c] sm:$0xf]  ;;  %v479_v51 = vld [vmem:[%s856_s0 + $0x38] sm:$0xf0]  ;;  %v474_v53 = vor.u32 %v615_v46, %v471_v47 }
  0x11   :  { %384 = vmatpush.bf16.msra.mxu3 %v647_v15  ;;  %v478_v54 = vor.u32 %v618_v49, %v477_v48  ;;  %v482_v55 = vor.u32 %v616_v50, %v479_v51  ;;  %v651_v56 = vld [vmem:[%s855_s2] ss:$0 sm:$0xff] }
  0x12   :  { %328 = vmatpush.bf16.msra.mxu0 %v622_v16 }
  0x13   :  { %347 = vmatpush.bf16.msra.mxu1 %v630_v17 }
  0x14   :  { %366 = vmatpush.bf16.msra.mxu2 %v638_v18 }
  0x15   :  { %385 = vmatpush.bf16.msra.mxu3 %v646_v19 }
  0x16   :  { %329 = vmatpush.bf16.msra.mxu0 %v621_v20 }
  0x17   :  { %348 = vmatpush.bf16.msra.mxu1 %v629_v21 }
  0x18   :  { %367 = vmatpush.bf16.msra.mxu2 %v637_v22 }
  0x19   :  { %386 = vmatpush.bf16.msra.mxu3 %v645_v23 }
  0x1a   :  { %330 = vmatpush.bf16.msra.mxu0 %v620_v24 }
  0x1b   :  { %349 = vmatpush.bf16.msra.mxu1 %v628_v25 }
  0x1c   :  { %368 = vmatpush.bf16.msra.mxu2 %v636_v26 }
  0x1d   :  { %387 = vmatpush.bf16.msra.mxu3 %v644_v27 }
  0x1e   :  { %331 = vmatpush.bf16.msra.mxu0 %v619_v28 }
  0x1f   :  { %350 = vmatpush.bf16.msra.mxu1 %v627_v29 }
  0x20   :  { %369 = vmatpush.bf16.msra.mxu2 %v635_v30 }
  0x21   :  { %388 = vmatpush.bf16.msra.mxu3 %v643_v31  ;;  %332 = vmatmul.bf16.vlgmr.msra.gmra.mxu0 %v454_v40 }
  0x22   :  { %351 = vmatmul.bf16.vlgmr.msra.gmra.mxu1 %v458_v41 }
  0x23   :  { %370 = vmatmul.bf16.vlgmr.msra.gmra.mxu2 %v462_v42 }
  0x24   :  { %389 = vmatmul.bf16.vlgmr.msra.gmra.mxu3 %v466_v43 }
  0x31   :  { %337 = vmatmul.bf16.gmra.mxu0 %v470_v52 }
  0x32   :  { %356 = vmatmul.bf16.gmra.mxu1 %v474_v53 }
  0x33   :  { %375 = vmatmul.bf16.gmra.mxu2 %v478_v54 }
  0x34   :  { %394 = vmatmul.bf16.gmra.mxu3 %v482_v55 }
  0x9e   :  { %v333_v57 = vpop.f32.mrf.mxu0 }
  0x9f   :  { %v352_v58 = vpop.f32.mrf.mxu1  ;;  %v334_v59 = vadd.f32 %v651_v56, %v333_v57 }
  0xa1   :  { %v353_v60 = vadd.f32 %v352_v58, %v334_v59 }
  0xa6   :  { %v371_v61 = vpop.f32.mrf.mxu2  ;;  %v335_v0 = vpop.f32.mrf.mxu0 }
  0xa7   :  { %v390_v62 = vpop.f32.mrf.mxu3  ;;  %v372_v63 = vadd.f32 %v371_v61, %v353_v60  ;;  %v354_v1 = vpop.f32.mrf.mxu1  ;;  %v336_v3 = vadd.f32 %v651_v56, %v335_v0 }
  0xa9   :  { %v391_v2 = vadd.f32 %v390_v62, %v372_v63  ;;  %v355_v5 = vadd.f32 %v354_v1, %v336_v3 }
  0xab   :  { %v400_v4 = vpack.c.bf16 %v391_v2, %v391_v2  ;;  %v425_v24 = vmul.f32 %v391_v2, %v391_v2  ;;  %v410_v29 = vsel %vm409_vm1, %v391_v2, 0.0 }
  0xad   :  { %405 = vst.msk [vmem:[%s857_s3] sm:$0xf] %vm404_vm0, %v400_v4  ;;  %v429_v35 = vsel %vm409_vm1, %v425_v24, 0.0 }
  0xae   :  { %v373_v6 = vpop.f32.mrf.mxu2  ;;  %v338_v9 = vpop.f32.mrf.mxu0 }
  0xaf   :  { %v392_v7 = vpop.f32.mrf.mxu3  ;;  %v374_v8 = vadd.f32 %v373_v6, %v355_v5  ;;  %v339_v10 = vadd.f32 %v651_v56, %v338_v9  ;;  %v357_v12 = vpop.f32.mrf.mxu1 }
  0xb1   :  { %v393_v11 = vadd.f32 %v392_v7, %v374_v8  ;;  %v358_v14 = vadd.f32 %v357_v12, %v339_v10 }
  0xb3   :  { %v401_v13 = vpack.c.bf16 %v393_v11, %v393_v11  ;;  %v426_v21 = vmul.f32 %v393_v11, %v393_v11  ;;  %v411_v25 = vsel %vm409_vm1, %v393_v11, 0.0 }
  0xb4   :  { %v412_v33 = vadd.f32 %v411_v25, %v410_v29 }
  0xb5   :  { %406 = vst.msk [vmem:[%s857_s3 + $0x4] sm:$0xf] %vm404_vm0, %v401_v13  ;;  %v430_v30 = vsel %vm409_vm1, %v426_v21, 0.0 }
  0xb6   :  { %v376_v15 = vpop.f32.mrf.mxu2  ;;  %v340_v18 = vpop.f32.mrf.mxu0  ;;  %v431_v38 = vadd.f32 %v430_v30, %v429_v35 }
  0xb7   :  { %v395_v16 = vpop.f32.mrf.mxu3  ;;  %v377_v17 = vadd.f32 %v376_v15, %v358_v14  ;;  %v341_v20 = vadd.f32 %v651_v56, %v340_v18  ;;  %v359_v23 = vpop.f32.mrf.mxu1 }
  0xb9   :  { %v396_v19 = vadd.f32 %v395_v16, %v377_v17  ;;  %v360_v27 = vadd.f32 %v359_v23, %v341_v20 }
  0xbb   :  { %v402_v22 = vpack.c.bf16 %v396_v19, %v396_v19  ;;  %v427_v26 = vmul.f32 %v396_v19, %v396_v19  ;;  %v413_v31 = vsel %vm409_vm1, %v396_v19, 0.0 }
  0xbc   :  { %v414_v39 = vadd.f32 %v413_v31, %v412_v33 }
  0xbd   :  { %407 = vst.msk [vmem:[%s857_s3 + $0x8] sm:$0xf] %vm404_vm0, %v402_v22  ;;  %v432_v36 = vsel %vm409_vm1, %v427_v26, 0.0 }
  0xbe   :  { %v378_v28 = vpop.f32.mrf.mxu2  ;;  %v433_v43 = vadd.f32 %v432_v36, %v431_v38 }
  0xbf   :  { %v379_v32 = vadd.f32 %v378_v28, %v360_v27  ;;  %v397_v34 = vpop.f32.mrf.mxu3 }
  0xc1   :  { %v398_v37 = vadd.f32 %v397_v34, %v379_v32 }
  0xc3   :  { %v403_v40 = vpack.c.bf16 %v398_v37, %v398_v37  ;;  %v415_v41 = vsel %vm409_vm1, %v398_v37, 0.0  ;;  %v428_v42 = vmul.f32 %v398_v37, %v398_v37 }
  0xc4   :  { %v416_v44 = vadd.f32 %v415_v41, %v414_v39 }
  0xc5   :  { %408 = vst.msk [vmem:[%s857_s3 + $0xc] sm:$0xf] %vm404_vm0, %v403_v40  ;;  %v434_v45 = vsel %vm409_vm1, %v428_v42, 0.0 }
  0xc6   :  { %v417_v46 = vrot.slane %v416_v44, 4  ;;  %v435_v47 = vadd.f32 %v434_v45, %v433_v43 }
  0xc8   :  { %v418_v48 = vadd.f32 %v417_v46, %v416_v44  ;;  %v436_v49 = vrot.slane %v435_v47, 4 }
  0xca   :  { %v419_v50 = vrot.slane %v418_v48, 2  ;;  %v437_v51 = vadd.f32 %v436_v49, %v435_v47 }
  0xcc   :  { %v420_v52 = vadd.f32 %v419_v50, %v418_v48  ;;  %v438_v53 = vrot.slane %v437_v51, 2 }
  0xce   :  { %v421_v54 = vrot.slane %v420_v52, 1  ;;  %v439_v55 = vadd.f32 %v438_v53, %v437_v51 }
  0xd0   :  { %v422_v56 = vadd.f32 %v421_v54, %v420_v52  ;;  %v440_v57 = vrot.slane %v439_v55, 1 }
  0xd2   :  { %424 = vst.msk [vmem:[%s858_s4] sm:$0x1] %vm423_vm2, %v422_v56  ;;  %v441_v58 = vadd.f32 %v440_v57, %v439_v55 }
  0xd4   :  { %442 = vst.msk [vmem:[%s858_s4 + $0x1] sm:$0x1] %vm423_vm2, %v441_v58 }

// kernel: discriminator_forward.7
= control target key start
LH: loop header
LB: loop body
LE: loop exit
PB: predicated region body
PF: predicated region fallthrough
CT: control target
= control target key end

     0   :  { %s733_s2 = inlined_call_operand.vmem [shape: bf16[512,128], index: 2, kind: input, shape index: {}]   ;;  %s734_s0 = inlined_call_operand.vmem [shape: bf16[16,512], index: 0, kind: input, shape index: {}]   ;;  %s735_s1 = inlined_call_operand.vmem [shape: f32[1,512], index: 1, kind: input, shape index: {}]   ;;  %s736_s3 = inlined_call_operand.vmem [shape: f32[1,128], index: 3, kind: input, shape index: {}]   ;;  %s737_s4 = inlined_call_operand.vmem [shape: f32[16,128], index: 4, kind: output, shape index: {}]  }
   0x1   :  { %v546_v0 = vld [vmem:[%s733_s2 + $0x38] sm:$0xff]  ;;  %v545_v4 = vld [vmem:[%s733_s2 + $0x30] sm:$0xff]  ;;  %v544_v8 = vld [vmem:[%s733_s2 + $0x28] sm:$0xff] }
   0x2   :  { %v554_v1 = vld [vmem:[%s733_s2 + $0x78] sm:$0xff]  ;;  %335 = vmatpush.bf16.msra.mxu0 %v546_v0  ;;  %v553_v5 = vld [vmem:[%s733_s2 + $0x70] sm:$0xff]  ;;  %v552_v9 = vld [vmem:[%s733_s2 + $0x68] sm:$0xff] }
   0x3   :  { %v562_v2 = vld [vmem:[%s733_s2 + $0xb8] sm:$0xff]  ;;  %349 = vmatpush.bf16.msra.mxu1 %v554_v1  ;;  %v561_v6 = vld [vmem:[%s733_s2 + $0xb0] sm:$0xff]  ;;  %v560_v10 = vld [vmem:[%s733_s2 + $0xa8] sm:$0xff] }
   0x4   :  { %v570_v3 = vld [vmem:[%s733_s2 + $0xf8] sm:$0xff]  ;;  %363 = vmatpush.bf16.msra.mxu2 %v562_v2  ;;  %v569_v7 = vld [vmem:[%s733_s2 + $0xf0] sm:$0xff]  ;;  %v568_v11 = vld [vmem:[%s733_s2 + $0xe8] sm:$0xff] }
   0x5   :  { %377 = vmatpush.bf16.msra.mxu3 %v570_v3  ;;  %v543_v12 = vld [vmem:[%s733_s2 + $0x20] sm:$0xff]  ;;  %v19_v17 = vld [vmem:[%s734_s0 + $0x10] sm:$0xff]  ;;  %v18_v19 = vld [vmem:[%s734_s0 + $0x8] sm:$0xff] }
   0x6   :  { %336 = vmatpush.bf16.msra.mxu0 %v545_v4  ;;  %v551_v13 = vld [vmem:[%s733_s2 + $0x60] sm:$0xff]  ;;  %v20_v22 = vld [vmem:[%s734_s0 + $0x18] sm:$0xff]  ;;  %v25_v23 = vunpack.c.l.bf16 %v19_v17  ;;  %v26_v28 = vunpack.c.h.bf16 %v19_v17  ;;  %v23_v29 = vunpack.c.l.bf16 %v18_v19  ;;  %v24_v35 = vunpack.c.h.bf16 %v18_v19  ;;  %v541_v40 = vld [vmem:[%s733_s2 + $0x10] sm:$0xff] }
   0x7   :  { %350 = vmatpush.bf16.msra.mxu1 %v553_v5  ;;  %v559_v14 = vld [vmem:[%s733_s2 + $0xa0] sm:$0xff]  ;;  %v542_v26 = vld [vmem:[%s733_s2 + $0x18] sm:$0xff]  ;;  %v27_v33 = vunpack.c.l.bf16 %v20_v22  ;;  %v28_v36 = vunpack.c.h.bf16 %v20_v22  ;;  %v549_v41 = vld [vmem:[%s733_s2 + $0x50] sm:$0xff] }
   0x8   :  { %364 = vmatpush.bf16.msra.mxu2 %v561_v6  ;;  %v567_v15 = vld [vmem:[%s733_s2 + $0xe0] sm:$0xff]  ;;  %v550_v27 = vld [vmem:[%s733_s2 + $0x58] sm:$0xff]  ;;  %v557_v44 = vld [vmem:[%s733_s2 + $0x90] sm:$0xff] }
   0x9   :  { %378 = vmatpush.bf16.msra.mxu3 %v569_v7  ;;  %v17_v16 = vld [vmem:[%s734_s0] sm:$0xff]  ;;  %v558_v31 = vld [vmem:[%s733_s2 + $0x98] sm:$0xff]  ;;  %v565_v45 = vld [vmem:[%s733_s2 + $0xd0] sm:$0xff] }
   0xa   :  { %337 = vmatpush.bf16.msra.mxu0 %v544_v8  ;;  %v29_v18 = vld [vmem:[%s735_s1] sm:$0xf]  ;;  %v21_v20 = vunpack.c.l.bf16 %v17_v16  ;;  %v22_v24 = vunpack.c.h.bf16 %v17_v16  ;;  %v566_v32 = vld [vmem:[%s733_s2 + $0xd8] sm:$0xff]  ;;  %v540_v47 = vld [vmem:[%s733_s2 + $0x8] sm:$0xff] }
   0xb   :  { %351 = vmatpush.bf16.msra.mxu1 %v552_v9  ;;  %v31_v21 = vperm.slane %v29_v18, 0  ;;  %v32_v25 = vperm.slane %v29_v18, 1  ;;  %v33_v30 = vperm.slane %v29_v18, 2  ;;  %v34_v37 = vperm.slane %v29_v18, 3  ;;  %v548_v48 = vld [vmem:[%s733_s2 + $0x48] sm:$0xff]  ;;  %v539_v63 = vld [vmem:[%s733_s2] sm:$0xff] }
   0xc   :  { %365 = vmatpush.bf16.msra.mxu2 %v560_v10  ;;  %v556_v52 = vld [vmem:[%s733_s2 + $0x88] sm:$0xff]  ;;  %v547_v0 = vld [vmem:[%s733_s2 + $0x40] sm:$0xff] }
   0xd   :  { %379 = vmatpush.bf16.msra.mxu3 %v568_v11  ;;  %v39_v34 = vmul.f32 %v31_v21, %v21_v20  ;;  %v43_v38 = vmul.f32 %v31_v21, %v25_v23  ;;  %v40_v39 = vmul.f32 %v32_v25, %v22_v24  ;;  %v44_v42 = vmul.f32 %v32_v25, %v26_v28  ;;  %v564_v53 = vld [vmem:[%s733_s2 + $0xc8] sm:$0xff]  ;;  %v555_v4 = vld [vmem:[%s733_s2 + $0x80] sm:$0xff] }
   0xe   :  { %338 = vmatpush.bf16.msra.mxu0 %v543_v12  ;;  %v41_v43 = vmul.f32 %v33_v30, %v23_v29  ;;  %v45_v46 = vmul.f32 %v33_v30, %v27_v33  ;;  %v42_v50 = vmul.f32 %v34_v37, %v24_v35  ;;  %v46_v51 = vmul.f32 %v34_v37, %v28_v36  ;;  %v563_v5 = vld [vmem:[%s733_s2 + $0xc0] sm:$0xff] }
   0xf   :  { %352 = vmatpush.bf16.msra.mxu1 %v551_v13  ;;  %vm47_vm0 = vcmp.gt.f32.partialorder %v39_v34, 0.0  ;;  %v55_v49 = vmul.f32 0.2, %v39_v34  ;;  %vm51_vm1 = vcmp.gt.f32.partialorder %v43_v38, 0.0  ;;  %v59_v54 = vmul.f32 0.2, %v43_v38 }
  0x10   :  { %366 = vmatpush.bf16.msra.mxu2 %v559_v14  ;;  %vm48_vm2 = vcmp.gt.f32.partialorder %v40_v39, 0.0  ;;  %v56_v55 = vmul.f32 0.2, %v40_v39  ;;  %vm52_vm3 = vcmp.gt.f32.partialorder %v44_v42, 0.0  ;;  %v60_v56 = vmul.f32 0.2, %v44_v42 }
  0x11   :  { %380 = vmatpush.bf16.msra.mxu3 %v567_v15  ;;  %vm49_vm4 = vcmp.gt.f32.partialorder %v41_v43, 0.0  ;;  %v57_v57 = vmul.f32 0.2, %v41_v43  ;;  %v61_v58 = vmul.f32 0.2, %v45_v46  ;;  %vm53_vm5 = vcmp.gt.f32.partialorder %v45_v46, 0.0 }
  0x12   :  { %339 = vmatpush.bf16.msra.mxu0 %v542_v26  ;;  %v58_v59 = vmul.f32 0.2, %v42_v50  ;;  %v62_v60 = vmul.f32 0.2, %v46_v51  ;;  %vm50_vm6 = vcmp.gt.f32.partialorder %v42_v50, 0.0  ;;  %vm54_vm7 = vcmp.gt.f32.partialorder %v46_v51, 0.0 }
  0x13   :  { %353 = vmatpush.bf16.msra.mxu1 %v550_v27  ;;  %v63_v61 = vsel %vm47_vm0, %v39_v34, %v55_v49  ;;  %v67_v62 = vsel %vm51_vm1, %v43_v38, %v59_v54  ;;  %v64_v1 = vsel %vm48_vm2, %v40_v39, %v56_v55  ;;  %v68_v2 = vsel %vm52_vm3, %v44_v42, %v60_v56  ;;  %v571_v13 = vld [vmem:[%s736_s3] ss:$0 sm:$0xff] }
  0x14   :  { %367 = vmatpush.bf16.msra.mxu2 %v558_v31  ;;  %v65_v3 = vsel %vm49_vm4, %v41_v43, %v57_v57  ;;  %v69_v6 = vsel %vm53_vm5, %v45_v46, %v61_v58  ;;  %v66_v7 = vsel %vm50_vm6, %v42_v50, %v58_v59  ;;  %v70_v8 = vsel %vm54_vm7, %v46_v51, %v62_v60 }
  0x15   :  { %381 = vmatpush.bf16.msra.mxu3 %v566_v32  ;;  %v71_v9 = vpack.c.bf16 %v67_v62, %v63_v61  ;;  %v72_v10 = vpack.c.bf16 %v68_v2, %v64_v1  ;;  %v73_v11 = vpack.c.bf16 %v69_v6, %v65_v3  ;;  %v74_v12 = vpack.c.bf16 %v70_v8, %v66_v7 }
  0x16   :  { %340 = vmatpush.bf16.msra.mxu0 %v541_v40 }
  0x17   :  { %354 = vmatpush.bf16.msra.mxu1 %v549_v41 }
  0x18   :  { %368 = vmatpush.bf16.msra.mxu2 %v557_v44 }
  0x19   :  { %382 = vmatpush.bf16.msra.mxu3 %v565_v45 }
  0x1a   :  { %341 = vmatpush.bf16.msra.mxu0 %v540_v47 }
  0x1b   :  { %355 = vmatpush.bf16.msra.mxu1 %v548_v48 }
  0x1c   :  { %369 = vmatpush.bf16.msra.mxu2 %v556_v52 }
  0x1d   :  { %383 = vmatpush.bf16.msra.mxu3 %v564_v53 }
  0x1e   :  { %342 = vmatpush.bf16.msra.mxu0 %v539_v63 }
  0x1f   :  { %356 = vmatpush.bf16.msra.mxu1 %v547_v0 }
  0x20   :  { %370 = vmatpush.bf16.msra.mxu2 %v555_v4 }
  0x21   :  { %384 = vmatpush.bf16.msra.mxu3 %v563_v5  ;;  %343 = vmatmul.bf16.vlgmr.msra.gmra.mxu0 %v71_v9 }
  0x22   :  { %357 = vmatmul.bf16.vlgmr.msra.gmra.mxu1 %v72_v10 }
  0x23   :  { %371 = vmatmul.bf16.vlgmr.msra.gmra.mxu2 %v73_v11 }
  0x24   :  { %385 = vmatmul.bf16.vlgmr.msra.gmra.mxu3 %v74_v12 }
  0x9e   :  { %v344_v14 = vpop.f32.mrf.mxu0 }
  0x9f   :  { %v345_v15 = vadd.f32 %v571_v13, %v344_v14  ;;  %v358_v16 = vpop.f32.mrf.mxu1 }
  0xa1   :  { %v359_v17 = vadd.f32 %v358_v16, %v345_v15 }
  0xa6   :  { %v372_v18 = vpop.f32.mrf.mxu2  ;;  %v346_v21 = vpop.f32.mrf.mxu0 }
  0xa7   :  { %v386_v19 = vpop.f32.mrf.mxu3  ;;  %v373_v20 = vadd.f32 %v372_v18, %v359_v17  ;;  %v347_v23 = vadd.f32 %v571_v13, %v346_v21  ;;  %v360_v25 = vpop.f32.mrf.mxu1 }
  0xa9   :  { %v387_v22 = vadd.f32 %v386_v19, %v373_v20  ;;  %v361_v27 = vadd.f32 %v360_v25, %v347_v23 }
  0xab   :  { %v391_v24 = vsub.f32 0.0, %v387_v22 }
  0xad   :  { %v393_v26 = vmul.f32 1.442695, %v391_v24 }
  0xae   :  { %v374_v28 = vpop.f32.mrf.mxu2 }
  0xaf   :  { %572 = vpow2.f32 %v393_v26  ;;  %v375_v29 = vadd.f32 %v374_v28, %v361_v27  ;;  %v388_v30 = vpop.f32.mrf.mxu3 }
  0xb1   :  { %v389_v31 = vadd.f32 %v388_v30, %v375_v29 }
  0xb3   :  { %v392_v32 = vsub.f32 0.0, %v389_v31 }
  0xb5   :  { %v573_v33 = vpop.eup %572  ;;  %v395_v34 = vmul.f32 1.442695, %v392_v32 }
  0xb6   :  { %v397_v35 = vadd.f32 1.0, %v573_v33 }
  0xb7   :  { %574 = vpow2.f32 %v395_v34 }
  0xb8   :  { %576 = vrcp.f32 %v397_v35 }
  0xbd   :  { %v575_v36 = vpop.eup %574 }
  0xbe   :  { %v577_v37 = vpop.eup %576  ;;  %v398_v38 = vadd.f32 1.0, %v575_v36 }
  0xbf   :  { %v401_v39 = vmax.f32 %v577_v37, 0.0 }
  0xc0   :  { %578 = vrcp.f32 %v398_v38 }
  0xc1   :  { %v403_v40 = vmin.f32 %v401_v39, 1.0 }
  0xc3   :  { %405 = vst [vmem:[%s737_s4] sm:$0xff] %v403_v40 }
  0xc6   :  { %v579_v41 = vpop.eup %578 }
  0xc7   :  { %v402_v42 = vmax.f32 %v579_v41, 0.0 }
  0xc9   :  { %v404_v43 = vmin.f32 %v402_v42, 1.0 }
  0xcb   :  { %406 = vst [vmem:[%s737_s4 + $0x8] sm:$0xff] %v404_v43 }

// kernel: discriminator_forward.6
= control target key start
LH: loop header
LB: loop body
LE: loop exit
PB: predicated region body
PF: predicated region fallthrough
CT: control target
= control target key end

     0   :  { %s1404_s2 = inlined_call_operand.vmem [shape: bf16[1024,128], index: 2, kind: input, shape index: {}]   ;;  %s1405_s0 = inlined_call_operand.vmem [shape: bf16[16,1024], index: 0, kind: input, shape index: {}]   ;;  %s1406_s1 = inlined_call_operand.vmem [shape: f32[1,1024], index: 1, kind: input, shape index: {}]   ;;  %s1407_s3 = inlined_call_operand.vmem [shape: f32[1,128], index: 3, kind: input, shape index: {}]   ;;  %s1408_s4 = inlined_call_operand.vmem [shape: bf16[16,128], index: 4, kind: output, shape index: {0}]   ;;  %s1409_s5 = inlined_call_operand.vmem [shape: f32[1,2,128], index: 5, kind: output, shape index: {1}]  }
   0x1   :  { %v1054_v0 = vld [vmem:[%s1404_s2 + $0x38] sm:$0xff]  ;;  %v1053_v4 = vld [vmem:[%s1404_s2 + $0x30] sm:$0xff]  ;;  %v1052_v8 = vld [vmem:[%s1404_s2 + $0x28] sm:$0xff] }
   0x2   :  { %v1062_v1 = vld [vmem:[%s1404_s2 + $0x78] sm:$0xff]  ;;  %649 = vmatpush.bf16.msra.mxu0 %v1054_v0  ;;  %v1061_v5 = vld [vmem:[%s1404_s2 + $0x70] sm:$0xff]  ;;  %v1060_v9 = vld [vmem:[%s1404_s2 + $0x68] sm:$0xff] }
   0x3   :  { %v1070_v2 = vld [vmem:[%s1404_s2 + $0xb8] sm:$0xff]  ;;  %663 = vmatpush.bf16.msra.mxu1 %v1062_v1  ;;  %v1069_v6 = vld [vmem:[%s1404_s2 + $0xb0] sm:$0xff]  ;;  %v1068_v10 = vld [vmem:[%s1404_s2 + $0xa8] sm:$0xff] }
   0x4   :  { %v1078_v3 = vld [vmem:[%s1404_s2 + $0xf8] sm:$0xff]  ;;  %677 = vmatpush.bf16.msra.mxu2 %v1070_v2  ;;  %v1077_v7 = vld [vmem:[%s1404_s2 + $0xf0] sm:$0xff]  ;;  %v1076_v11 = vld [vmem:[%s1404_s2 + $0xe8] sm:$0xff] }
   0x5   :  { %691 = vmatpush.bf16.msra.mxu3 %v1078_v3  ;;  %v1051_v12 = vld [vmem:[%s1404_s2 + $0x20] sm:$0xff]  ;;  %v20_v16 = vld [vmem:[%s1405_s0 + $0x8] sm:$0xff]  ;;  %v1050_v18 = vld [vmem:[%s1404_s2 + $0x18] sm:$0xff] }
   0x6   :  { %650 = vmatpush.bf16.msra.mxu0 %v1053_v4  ;;  %v1059_v13 = vld [vmem:[%s1404_s2 + $0x60] sm:$0xff]  ;;  %v24_v17 = vld [vmem:[%s1405_s0 + $0x28] sm:$0xff]  ;;  %v1058_v19 = vld [vmem:[%s1404_s2 + $0x58] sm:$0xff]  ;;  %v29_v20 = vunpack.c.l.bf16 %v20_v16  ;;  %v30_v23 = vunpack.c.h.bf16 %v20_v16 }
   0x7   :  { %664 = vmatpush.bf16.msra.mxu1 %v1061_v5  ;;  %v1067_v14 = vld [vmem:[%s1404_s2 + $0xa0] sm:$0xff]  ;;  %v37_v21 = vunpack.c.l.bf16 %v24_v17  ;;  %v1066_v24 = vld [vmem:[%s1404_s2 + $0x98] sm:$0xff]  ;;  %v38_v32 = vunpack.c.h.bf16 %v24_v17  ;;  %v1049_v38 = vld [vmem:[%s1404_s2 + $0x10] sm:$0xff] }
   0x8   :  { %678 = vmatpush.bf16.msra.mxu2 %v1069_v6  ;;  %v1075_v15 = vld [vmem:[%s1404_s2 + $0xe0] sm:$0xff]  ;;  %v1074_v25 = vld [vmem:[%s1404_s2 + $0xd8] sm:$0xff]  ;;  %v1057_v39 = vld [vmem:[%s1404_s2 + $0x50] sm:$0xff] }
   0x9   :  { %692 = vmatpush.bf16.msra.mxu3 %v1077_v7  ;;  %v1210_v22 = vld [vmem:[%s1406_s1] sm:$0xff]  ;;  %v1065_v42 = vld [vmem:[%s1404_s2 + $0x90] sm:$0xff]  ;;  %v1048_v45 = vld [vmem:[%s1404_s2 + $0x8] sm:$0xff] }
   0xa   :  { %651 = vmatpush.bf16.msra.mxu0 %v1052_v8  ;;  %v47_v26 = vperm.slane %v1210_v22, 2  ;;  %v19_v27 = vld [vmem:[%s1405_s0] sm:$0xff]  ;;  %v45_v28 = vperm.slane %v1210_v22, 0  ;;  %v48_v29 = vperm.slane %v1210_v22, 3  ;;  %v46_v34 = vperm.slane %v1210_v22, 1  ;;  %v1073_v43 = vld [vmem:[%s1404_s2 + $0xd0] sm:$0xff] }
   0xb   :  { %665 = vmatpush.bf16.msra.mxu1 %v1060_v9  ;;  %v23_v30 = vld [vmem:[%s1405_s0 + $0x20] sm:$0xff]  ;;  %v27_v31 = vunpack.c.l.bf16 %v19_v27  ;;  %v28_v33 = vunpack.c.h.bf16 %v19_v27  ;;  %v1056_v49 = vld [vmem:[%s1404_s2 + $0x48] sm:$0xff]  ;;  %v1086_v5 = vld [vmem:[%s1404_s2 + $0x138] sm:$0xff] }
   0xc   :  { %679 = vmatpush.bf16.msra.mxu2 %v1068_v10  ;;  %v63_v35 = vmul.f32 %v47_v26, %v29_v20  ;;  %v71_v36 = vmul.f32 %v47_v26, %v37_v21  ;;  %v35_v37 = vunpack.c.l.bf16 %v23_v30  ;;  %v64_v41 = vmul.f32 %v48_v29, %v30_v23  ;;  %v1064_v50 = vld [vmem:[%s1404_s2 + $0x88] sm:$0xff]  ;;  %v1047_v61 = vld [vmem:[%s1404_s2] sm:$0xff]  ;;  %v1094_v6 = vld [vmem:[%s1404_s2 + $0x178] sm:$0xff] }
   0xd   :  { %693 = vmatpush.bf16.msra.mxu3 %v1076_v11  ;;  %v61_v40 = vmul.f32 %v45_v28, %v27_v31  ;;  %v36_v44 = vunpack.c.h.bf16 %v23_v30  ;;  %v72_v47 = vmul.f32 %v48_v29, %v38_v32  ;;  %v62_v48 = vmul.f32 %v46_v34, %v28_v33  ;;  %v1072_v54 = vld [vmem:[%s1404_s2 + $0xc8] sm:$0xff]  ;;  %v1055_v62 = vld [vmem:[%s1404_s2 + $0x40] sm:$0xff]  ;;  %v1102_v11 = vld [vmem:[%s1404_s2 + $0x1b8] sm:$0xff] }
   0xe   :  { %652 = vmatpush.bf16.msra.mxu0 %v1051_v12  ;;  %v69_v46 = vmul.f32 %v45_v28, %v35_v37  ;;  %vm79_vm0 = vcmp.gt.f32.partialorder %v63_v35, 0.0  ;;  %vm87_vm1 = vcmp.gt.f32.partialorder %v71_v36, 0.0  ;;  %v95_v51 = vmul.f32 0.2, %v63_v35  ;;  %v1063_v0 = vld [vmem:[%s1404_s2 + $0x80] sm:$0xff]  ;;  %v1110_v12 = vld [vmem:[%s1404_s2 + $0x1f8] sm:$0xff] }
   0xf   :  { %666 = vmatpush.bf16.msra.mxu1 %v1059_v13  ;;  %v103_v52 = vmul.f32 0.2, %v71_v36  ;;  %vm77_vm2 = vcmp.gt.f32.partialorder %v61_v40, 0.0  ;;  %v93_v53 = vmul.f32 0.2, %v61_v40  ;;  %vm80_vm3 = vcmp.gt.f32.partialorder %v64_v41, 0.0 }
  0x10   :  { %680 = vmatpush.bf16.msra.mxu2 %v1067_v14  ;;  %vm85_vm4 = vcmp.gt.f32.partialorder %v69_v46, 0.0  ;;  %v101_v55 = vmul.f32 0.2, %v69_v46  ;;  %v96_v56 = vmul.f32 0.2, %v64_v41  ;;  %v70_v57 = vmul.f32 %v46_v34, %v36_v44  ;;  %v1071_v1 = vld [vmem:[%s1404_s2 + $0xc0] sm:$0xff] }
  0x11   :  { %694 = vmatpush.bf16.msra.mxu3 %v1075_v15  ;;  %v104_v58 = vmul.f32 0.2, %v72_v47  ;;  %v94_v59 = vmul.f32 0.2, %v62_v48  ;;  %vm88_vm5 = vcmp.gt.f32.partialorder %v72_v47, 0.0  ;;  %vm78_vm6 = vcmp.gt.f32.partialorder %v62_v48, 0.0 }
  0x12   :  { %653 = vmatpush.bf16.msra.mxu0 %v1050_v18  ;;  %vm86_vm7 = vcmp.gt.f32.partialorder %v70_v57, 0.0  ;;  %v102_v60 = vmul.f32 0.2, %v70_v57  ;;  %v111_v63 = vsel %vm79_vm0, %v63_v35, %v95_v51  ;;  %v119_v2 = vsel %vm87_vm1, %v71_v36, %v103_v52  ;;  %v1085_v17 = vld [vmem:[%s1404_s2 + $0x130] sm:$0xff]  ;;  %v1084_v21 = vld [vmem:[%s1404_s2 + $0x128] sm:$0xff]  ;;  %v1083_v27 = vld [vmem:[%s1404_s2 + $0x120] sm:$0xff] }
  0x13   :  { %667 = vmatpush.bf16.msra.mxu1 %v1058_v19  ;;  %v109_v3 = vsel %vm77_vm2, %v61_v40, %v93_v53  ;;  %v117_v4 = vsel %vm85_vm4, %v69_v46, %v101_v55  ;;  %v112_v7 = vsel %vm80_vm3, %v64_v41, %v96_v56  ;;  %v120_v8 = vsel %vm88_vm5, %v72_v47, %v104_v58  ;;  %v1093_v18 = vld [vmem:[%s1404_s2 + $0x170] sm:$0xff]  ;;  %v1092_v23 = vld [vmem:[%s1404_s2 + $0x168] sm:$0xff]  ;;  %v1091_v28 = vld [vmem:[%s1404_s2 + $0x160] sm:$0xff] }
  0x14   :  { %681 = vmatpush.bf16.msra.mxu2 %v1066_v24  ;;  %v110_v9 = vsel %vm78_vm6, %v62_v48, %v94_v59  ;;  %v118_v10 = vsel %vm86_vm7, %v70_v57, %v102_v60  ;;  %v127_v13 = vpack.c.bf16 %v119_v2, %v111_v63  ;;  %v125_v14 = vpack.c.bf16 %v117_v4, %v109_v3  ;;  %v1101_v19 = vld [vmem:[%s1404_s2 + $0x1b0] sm:$0xff]  ;;  %v1100_v24 = vld [vmem:[%s1404_s2 + $0x1a8] sm:$0xff]  ;;  %v1099_v30 = vld [vmem:[%s1404_s2 + $0x1a0] sm:$0xff] }
  0x15   :  { %695 = vmatpush.bf16.msra.mxu3 %v1074_v25  ;;  %v128_v15 = vpack.c.bf16 %v120_v8, %v112_v7  ;;  %v126_v16 = vpack.c.bf16 %v118_v10, %v110_v9  ;;  %v1109_v20 = vld [vmem:[%s1404_s2 + $0x1f0] sm:$0xff]  ;;  %v1108_v25 = vld [vmem:[%s1404_s2 + $0x1e8] sm:$0xff]  ;;  %v1107_v31 = vld [vmem:[%s1404_s2 + $0x1e0] sm:$0xff]  ;;  %v49_v34 = vperm.slane %v1210_v22, 4 }
  0x16   :  { %654 = vmatpush.bf16.msra.mxu0 %v1049_v38  ;;  %v21_v26 = vld [vmem:[%s1405_s0 + $0x10] sm:$0xff]  ;;  %v22_v32 = vld [vmem:[%s1405_s0 + $0x18] sm:$0xff]  ;;  %v50_v38 = vperm.slane %v1210_v22, 5 }
  0x17   :  { %668 = vmatpush.bf16.msra.mxu1 %v1057_v39  ;;  %v25_v29 = vld [vmem:[%s1405_s0 + $0x30] sm:$0xff]  ;;  %v31_v33 = vunpack.c.l.bf16 %v21_v26  ;;  %v26_v35 = vld [vmem:[%s1405_s0 + $0x38] sm:$0xff]  ;;  %v32_v37 = vunpack.c.h.bf16 %v21_v26  ;;  %v34_v47 = vunpack.c.h.bf16 %v22_v32 }
  0x18   :  { %682 = vmatpush.bf16.msra.mxu2 %v1065_v42  ;;  %v39_v36 = vunpack.c.l.bf16 %v25_v29  ;;  %v1082_v39 = vld [vmem:[%s1404_s2 + $0x118] sm:$0xff]  ;;  %v40_v41 = vunpack.c.h.bf16 %v25_v29  ;;  %v33_v42 = vunpack.c.l.bf16 %v22_v32  ;;  %v41_v46 = vunpack.c.l.bf16 %v26_v35  ;;  %v1081_v53 = vld [vmem:[%s1404_s2 + $0x110] sm:$0xff] }
  0x19   :  { %696 = vmatpush.bf16.msra.mxu3 %v1073_v43  ;;  %v1090_v40 = vld [vmem:[%s1404_s2 + $0x158] sm:$0xff]  ;;  %v51_v43 = vperm.slane %v1210_v22, 6  ;;  %v42_v48 = vunpack.c.h.bf16 %v26_v35  ;;  %v66_v52 = vmul.f32 %v50_v38, %v32_v37  ;;  %v1105_v57 = vld [vmem:[%s1404_s2 + $0x1d0] sm:$0xff] }
  0x1a   :  { %655 = vmatpush.bf16.msra.mxu0 %v1048_v45  ;;  %v1098_v44 = vld [vmem:[%s1404_s2 + $0x198] sm:$0xff]  ;;  %v73_v51 = vmul.f32 %v49_v34, %v39_v36  ;;  %v74_v55 = vmul.f32 %v50_v38, %v40_v41 }
  0x1b   :  { %669 = vmatpush.bf16.msra.mxu1 %v1056_v49  ;;  %v1106_v45 = vld [vmem:[%s1404_s2 + $0x1d8] sm:$0xff]  ;;  %v52_v49 = vperm.slane %v1210_v22, 7  ;;  %v67_v56 = vmul.f32 %v51_v43, %v33_v42  ;;  %v1097_v22 = vld [vmem:[%s1404_s2 + $0x190] sm:$0xff]  ;;  %v75_v58 = vmul.f32 %v51_v43, %v41_v46  ;;  %vm82_vm10 = vcmp.gt.f32.partialorder %v66_v52, 0.0 }
  0x1c   :  { %683 = vmatpush.bf16.msra.mxu2 %v1064_v50  ;;  %v65_v50 = vmul.f32 %v49_v34, %v31_v33  ;;  %vm89_vm9 = vcmp.gt.f32.partialorder %v73_v51, 0.0  ;;  %v105_v2 = vmul.f32 0.2, %v73_v51  ;;  %v98_v3 = vmul.f32 0.2, %v66_v52 }
  0x1d   :  { %697 = vmatpush.bf16.msra.mxu3 %v1072_v54  ;;  %v1089_v54 = vld [vmem:[%s1404_s2 + $0x150] sm:$0xff]  ;;  %v68_v59 = vmul.f32 %v52_v49, %v34_v47  ;;  %v76_v60 = vmul.f32 %v52_v49, %v42_v48  ;;  %vm90_vm11 = vcmp.gt.f32.partialorder %v74_v55, 0.0  ;;  %v106_v4 = vmul.f32 0.2, %v74_v55 }
  0x1e   :  { %656 = vmatpush.bf16.msra.mxu0 %v1047_v61  ;;  %v1080_v61 = vld [vmem:[%s1404_s2 + $0x108] sm:$0xff]  ;;  %vm81_vm8 = vcmp.gt.f32.partialorder %v65_v50, 0.0  ;;  %v97_v63 = vmul.f32 0.2, %v65_v50  ;;  %vm83_vm12 = vcmp.gt.f32.partialorder %v67_v56, 0.0  ;;  %vm91_vm13 = vcmp.gt.f32.partialorder %v75_v58, 0.0 }
  0x1f   :  { %670 = vmatpush.bf16.msra.mxu1 %v1055_v62  ;;  %v1088_v62 = vld [vmem:[%s1404_s2 + $0x148] sm:$0xff]  ;;  %v100_v7 = vmul.f32 0.2, %v68_v59  ;;  %v108_v8 = vmul.f32 0.2, %v76_v60  ;;  %vm84_vm14 = vcmp.gt.f32.partialorder %v68_v59, 0.0  ;;  %v121_v10 = vsel %vm89_vm9, %v73_v51, %v105_v2 }
  0x20   :  { %684 = vmatpush.bf16.msra.mxu2 %v1063_v0  ;;  %v1096_v0 = vld [vmem:[%s1404_s2 + $0x188] sm:$0xff]  ;;  %vm92_vm15 = vcmp.gt.f32.partialorder %v76_v60, 0.0  ;;  %v113_v9 = vsel %vm81_vm8, %v65_v50, %v97_v63 }
  0x21   :  { %698 = vmatpush.bf16.msra.mxu3 %v1071_v1  ;;  %657 = vmatmul.bf16.vlgmr.msra.gmra.mxu0 %v125_v14  ;;  %v1104_v1 = vld [vmem:[%s1404_s2 + $0x1c8] sm:$0xff]  ;;  %v122_v14 = vsel %vm90_vm11, %v74_v55, %v106_v4 }
  0x22   :  { %705 = vmatpush.bf16.msrb.mxu0 %v1086_v5  ;;  %671 = vmatmul.bf16.vlgmr.msra.gmra.mxu1 %v126_v16  ;;  %v99_v5 = vmul.f32 0.2, %v67_v56  ;;  %v1095_v16 = vld [vmem:[%s1404_s2 + $0x180] sm:$0xff] }
  0x23   :  { %719 = vmatpush.bf16.msrb.mxu1 %v1094_v6  ;;  %685 = vmatmul.bf16.vlgmr.msra.gmra.mxu2 %v127_v13  ;;  %v107_v6 = vmul.f32 0.2, %v75_v58  ;;  %v114_v13 = vsel %vm82_vm10, %v66_v52, %v98_v3 }
  0x24   :  { %733 = vmatpush.bf16.msrb.mxu2 %v1102_v11  ;;  %699 = vmatmul.bf16.vlgmr.msra.gmra.mxu3 %v128_v15  ;;  %v1079_v11 = vld [vmem:[%s1404_s2 + $0x100] sm:$0xff]  ;;  %v115_v15 = vsel %vm83_vm12, %v67_v56, %v99_v5 }
  0x25   :  { %747 = vmatpush.bf16.msrb.mxu3 %v1110_v12  ;;  %v1087_v12 = vld [vmem:[%s1404_s2 + $0x140] sm:$0xff] }
  0x26   :  { %706 = vmatpush.bf16.msrb.mxu0 %v1085_v17  ;;  %v1103_v17 = vld [vmem:[%s1404_s2 + $0x1c0] sm:$0xff] }
  0x27   :  { %720 = vmatpush.bf16.msrb.mxu1 %v1093_v18  ;;  %v123_v18 = vsel %vm91_vm13, %v75_v58, %v107_v6 }
  0x28   :  { %734 = vmatpush.bf16.msrb.mxu2 %v1101_v19  ;;  %v116_v19 = vsel %vm84_vm14, %v68_v59, %v100_v7 }
  0x29   :  { %748 = vmatpush.bf16.msrb.mxu3 %v1109_v20  ;;  %v124_v20 = vsel %vm92_vm15, %v76_v60, %v108_v8 }
  0x2a   :  { %707 = vmatpush.bf16.msrb.mxu0 %v1084_v21  ;;  %v129_v21 = vpack.c.bf16 %v121_v10, %v113_v9 }
  0x2b   :  { %721 = vmatpush.bf16.msrb.mxu1 %v1092_v23  ;;  %v130_v23 = vpack.c.bf16 %v122_v14, %v114_v13 }
  0x2c   :  { %735 = vmatpush.bf16.msrb.mxu2 %v1100_v24  ;;  %v131_v24 = vpack.c.bf16 %v123_v18, %v115_v15 }
  0x2d   :  { %749 = vmatpush.bf16.msrb.mxu3 %v1108_v25  ;;  %v132_v25 = vpack.c.bf16 %v124_v20, %v116_v19 }
  0x2e   :  { %708 = vmatpush.bf16.msrb.mxu0 %v1083_v27 }
  0x2f   :  { %722 = vmatpush.bf16.msrb.mxu1 %v1091_v28  ;;  %v1116_v28 = vld [vmem:[%s1407_s3] ss:$0 sm:$0xff] }
  0x30   :  { %736 = vmatpush.bf16.msrb.mxu2 %v1099_v30 }
  0x31   :  { %750 = vmatpush.bf16.msrb.mxu3 %v1107_v31 }
  0x32   :  { %709 = vmatpush.bf16.msrb.mxu0 %v1082_v39 }
  0x33   :  { %723 = vmatpush.bf16.msrb.mxu1 %v1090_v40 }
  0x34   :  { %737 = vmatpush.bf16.msrb.mxu2 %v1098_v44 }
  0x35   :  { %751 = vmatpush.bf16.msrb.mxu3 %v1106_v45 }
  0x36   :  { %710 = vmatpush.bf16.msrb.mxu0 %v1081_v53 }
  0x37   :  { %724 = vmatpush.bf16.msrb.mxu1 %v1089_v54 }
  0x38   :  { %738 = vmatpush.bf16.msrb.mxu2 %v1097_v22 }
  0x39   :  { %752 = vmatpush.bf16.msrb.mxu3 %v1105_v57 }
  0x3a   :  { %711 = vmatpush.bf16.msrb.mxu0 %v1080_v61 }
  0x3b   :  { %725 = vmatpush.bf16.msrb.mxu1 %v1088_v62 }
  0x3c   :  { %739 = vmatpush.bf16.msrb.mxu2 %v1096_v0 }
  0x3d   :  { %753 = vmatpush.bf16.msrb.mxu3 %v1104_v1 }
  0x3e   :  { %712 = vmatpush.bf16.msrb.mxu0 %v1079_v11 }
  0x3f   :  { %726 = vmatpush.bf16.msrb.mxu1 %v1087_v12 }
  0x40   :  { %740 = vmatpush.bf16.msrb.mxu2 %v1095_v16 }
  0x41   :  { %754 = vmatpush.bf16.msrb.mxu3 %v1103_v17  ;;  %713 = vmatmul.bf16.vlgmr.msrb.gmra.mxu0 %v129_v21 }
  0x42   :  { %727 = vmatmul.bf16.vlgmr.msrb.gmra.mxu1 %v130_v23 }
  0x43   :  { %741 = vmatmul.bf16.vlgmr.msrb.gmra.mxu2 %v131_v24 }
  0x44   :  { %755 = vmatmul.bf16.vlgmr.msrb.gmra.mxu3 %v132_v25 }
  0x9e   :  { %v658_v26 = vpop.f32.mrf.mxu0 }
  0x9f   :  { %v672_v27 = vpop.f32.mrf.mxu1  ;;  %v659_v31 = vadd.f32 %v1116_v28, %v658_v26 }
  0xa1   :  { %v673_v34 = vadd.f32 %v672_v27, %v659_v31 }
  0xa6   :  { %v686_v29 = vpop.f32.mrf.mxu2  ;;  %v660_v32 = vpop.f32.mrf.mxu0 }
  0xa7   :  { %v700_v30 = vpop.f32.mrf.mxu3  ;;  %v674_v33 = vpop.f32.mrf.mxu1  ;;  %v661_v35 = vadd.f32 %v1116_v28, %v660_v32  ;;  %v687_v38 = vadd.f32 %v686_v29, %v673_v34 }
  0xa9   :  { %v675_v39 = vadd.f32 %v674_v33, %v661_v35  ;;  %v701_v42 = vadd.f32 %v700_v30, %v687_v38 }
  0xae   :  { %v688_v36 = vpop.f32.mrf.mxu2 }
  0xaf   :  { %v702_v37 = vpop.f32.mrf.mxu3  ;;  %v689_v43 = vadd.f32 %v688_v36, %v675_v39 }
  0xb1   :  { %v703_v47 = vadd.f32 %v702_v37, %v689_v43 }
  0xbe   :  { %v714_v40 = vpop.f32.mrf.mxu0 }
  0xbf   :  { %v728_v41 = vpop.f32.mrf.mxu1  ;;  %v715_v44 = vadd.f32 %v714_v40, %v701_v42 }
  0xc1   :  { %v729_v49 = vadd.f32 %v728_v41, %v715_v44 }
  0xc6   :  { %v742_v45 = vpop.f32.mrf.mxu2  ;;  %v716_v48 = vpop.f32.mrf.mxu0 }
  0xc7   :  { %v756_v46 = vpop.f32.mrf.mxu3  ;;  %v717_v50 = vadd.f32 %v716_v48, %v703_v47  ;;  %v743_v51 = vadd.f32 %v742_v45, %v729_v49  ;;  %v730_v52 = vpop.f32.mrf.mxu1 }
  0xc9   :  { %v731_v53 = vadd.f32 %v730_v52, %v717_v50  ;;  %v757_v55 = vadd.f32 %v756_v46, %v743_v51 }
  0xcb   :  { %v773_v58 = vmul.f32 %v757_v55, %v757_v55 }
  0xce   :  { %v744_v54 = vpop.f32.mrf.mxu2 }
  0xcf   :  { %v745_v56 = vadd.f32 %v744_v54, %v731_v53  ;;  %v758_v22 = vpop.f32.mrf.mxu3 }
  0xd1   :  { %v759_v57 = vadd.f32 %v758_v22, %v745_v56 }
  0xd3   :  { %v1114_v59 = vpack.c.bf16 %v759_v57, %v757_v55  ;;  %v765_v60 = vadd.f32 %v759_v57, %v757_v55  ;;  %v774_v61 = vmul.f32 %v759_v57, %v759_v57 }
  0xd5   :  { %1115 = vst [vmem:[%s1408_s4] sm:$0xff] %v1114_v59   ;;  %v766_v62 = vrot.slane %v765_v60, 4  ;;  %v775_v63 = vadd.f32 %v774_v61, %v773_v58 }
  0xd7   :  { %v767_v0 = vadd.f32 %v766_v62, %v765_v60  ;;  %v776_v1 = vrot.slane %v775_v63, 4 }
  0xd9   :  { %v768_v2 = vrot.slane %v767_v0, 2  ;;  %v777_v3 = vadd.f32 %v776_v1, %v775_v63 }
  0xdb   :  { %v769_v4 = vadd.f32 %v768_v2, %v767_v0  ;;  %v778_v5 = vrot.slane %v777_v3, 2 }
  0xdd   :  { %v770_v6 = vrot.slane %v769_v4, 1  ;;  %v779_v7 = vadd.f32 %v778_v5, %v777_v3 }
  0xdf   :  { %v771_v8 = vadd.f32 %v770_v6, %v769_v4  ;;  %v780_v9 = vrot.slane %v779_v7, 1 }
  0xe1   :  { %772 = vst [vmem:[%s1409_s5] sm:$0x1] %v771_v8  ;;  %v781_v10 = vadd.f32 %v780_v9, %v779_v7 }
  0xe3   :  { %782 = vst [vmem:[%s1409_s5 + $0x1] sm:$0x1] %v781_v10 }

</bundles_post_ra>
